<compile_context>
chip_gen: v7x
topology: tpu7x:2x2x1
jax: 0.10.0
libtpu: 0.0.40
codegen_flags: <defaults>
</compile_context>

<pallas_src>
import jax
import jax.numpy as jnp
from jax.experimental import pallas as pl
from jax.experimental.pallas import tpu as pltpu


# ----------------------------------------------------------------------------
# Fused kernel: all LSTM layers + final FC, fully VMEM-resident, no grid.
# ----------------------------------------------------------------------------
def _lstm_cell(g, c_prev, H):
    """g: (Bp, 4H) f32 pre-activations; returns (h, c) in f32."""
    i_g = jax.nn.sigmoid(g[:, 0 * H:1 * H])
    f_g = jax.nn.sigmoid(g[:, 1 * H:2 * H])
    g_g = jnp.tanh(g[:, 2 * H:3 * H])
    o_g = jax.nn.sigmoid(g[:, 3 * H:4 * H])
    c = f_g * c_prev + i_g * g_g
    h = o_g * jnp.tanh(c)
    return h, c


def _make_fused_kernel(num_layers, T, Bp, H):
    """Ref order (as passed by pallas_call):
       x_tm, w_ih0, w_hh0, [w_rest], biases, fc_w, fc_b, out
    """
    G = 4 * H

    def kernel(*refs):
        if num_layers > 1:
            (x_ref, w_ih0_ref, w_hh0_ref, w_rest_ref, b_ref,
             fc_w_ref, fc_b_ref, out_ref) = refs
        else:
            (x_ref, w_ih0_ref, w_hh0_ref, b_ref,
             fc_w_ref, fc_b_ref, out_ref) = refs
            w_rest_ref = None

        D = x_ref.shape[-1]
        b_all = b_ref[...]                                        # (L, 4H) f32

        # ---- Hoisted layer-0 input projection: ONE sequence-wide matmul,
        #      off the recurrent critical path.  bf16 operands, f32 accumulate.
        x_flat = x_ref[...].reshape(T * Bp, D).astype(jnp.bfloat16)
        g0_all = (jnp.dot(x_flat, w_ih0_ref[...],
                          preferred_element_type=jnp.float32)
                  + b_all[0][None, :])                            # (T*Bp, 4H)

        # Hoist all weight loads out of the time loop.
        w_hh0 = w_hh0_ref[...]                                    # (H, 4H) bf16
        w_rest = ([w_rest_ref[l] for l in range(num_layers - 1)]
                  if num_layers > 1 else [])                      # (2H, 4H) bf16
        b_rest = [b_all[l][None, :] for l in range(1, num_layers)]

        h = [jnp.zeros((Bp, H), jnp.float32) for _ in range(num_layers)]
        c = [jnp.zeros((Bp, H), jnp.float32) for _ in range(num_layers)]

        # ---- Wavefront: loop over time, inner loop over layers.  No hseq
        #      scratch; only one MXU push per layer per step on the serial path.
        #      Fully unrolled (static, small T).
        for t in range(T):
            # Layer 0: input projection precomputed; only h @ W_hh is serial.
            g = (g0_all[t * Bp:(t + 1) * Bp]
                 + jnp.dot(h[0].astype(jnp.bfloat16), w_hh0,
                           preferred_element_type=jnp.float32))
            h[0], c[0] = _lstm_cell(g, c[0], H)
            for l in range(1, num_layers):
                inp = jnp.concatenate([h[l - 1], h[l]],
                                      axis=1).astype(jnp.bfloat16)  # (Bp, 2H)
                g = (jnp.dot(inp, w_rest[l - 1],
                             preferred_element_type=jnp.float32)
                     + b_rest[l - 1])
                h[l], c[l] = _lstm_cell(g, c[l], H)

        # ---- Final FC on the last-timestep hidden of the last layer (fused;
        #      no separate launch, no full-sequence writeback).
        out_ref[...] = (jnp.dot(h[-1].astype(jnp.bfloat16), fc_w_ref[...],
                                preferred_element_type=jnp.float32)
                        + fc_b_ref[...])

    return kernel


# ----------------------------------------------------------------------------
# Forward pass (matches TaskConfigNetwork.forward semantics).
# ----------------------------------------------------------------------------
@jax.jit
def task_config_forward(x, params):
    """x: (B, T, input_size), batch_first like the PyTorch module."""
    B, T, _ = x.shape

    # Time-major (T, Bp, D): leading-dim per-step slices are contiguous views.
    # Batch (sublane dim of all (B, .) tiles) padded to a multiple of 8 (f32).
    pad = (-B) % 8
    x_tm = jnp.transpose(x.astype(jnp.float32), (1, 0, 2))       # (T, B, D)
    if pad:
        x_tm = jnp.pad(x_tm, ((0, 0), (0, pad), (0, 0)))
    Bp = B + pad

    lstm = params["lstm"]
    num_layers = len(lstm)
    H = lstm[0]["w_hh_t"].shape[0]
    O = params["fc_w_t"].shape[1]

    # Pre-cast MXU operands to bf16; biases stay f32.  Pack per-layer weights
    # ([W_ih; W_hh] row-concat for layers >= 1) and stack biases -> fewer DMAs.
    w_ih0 = lstm[0]["w_ih_t"].astype(jnp.bfloat16)               # (D, 4H)
    w_hh0 = lstm[0]["w_hh_t"].astype(jnp.bfloat16)               # (H, 4H)
    biases = jnp.concatenate([l["b"] for l in lstm], axis=0)     # (L, 4H) f32
    fc_w = params["fc_w_t"].astype(jnp.bfloat16)                 # (H, O)
    fc_b = params["fc_b"].astype(jnp.float32)                    # (1, O)

    args = [x_tm, w_ih0, w_hh0]
    if num_layers > 1:
        w_rest = jnp.stack(
            [jnp.concatenate([l["w_ih_t"], l["w_hh_t"]], axis=0)
             for l in lstm[1:]], axis=0).astype(jnp.bfloat16)    # (L-1, 2H, 4H)
        args.append(w_rest)
    args += [biases, fc_w, fc_b]

    vmem = pl.BlockSpec(memory_space=pltpu.MemorySpace.VMEM)
    out = pl.pallas_call(
        _make_fused_kernel(num_layers, T, Bp, H),
        out_shape=jax.ShapeDtypeStruct((Bp, O), jnp.float32),
        in_specs=[vmem] * len(args),
        out_specs=vmem,
        # No grid: the whole (tiny) problem is VMEM-resident straight-line
        # code.  For large batches on v7x, add a leading "parallel" batch-block
        # grid axis so both TensorCores each take half the batch.
        compiler_params=pltpu.CompilerParams(
            vmem_limit_bytes=32 * 1024 * 1024),
    )(*args)
    # Padded rows carry garbage h/c (sigmoid(0) != 0) -> slice them off.
    return out[:B]


# ----------------------------------------------------------------------------
# Parameter init (deterministic, same shapes as nn.LSTM / nn.Linear).
# ----------------------------------------------------------------------------
def init_params(key, input_size, hidden_size, num_layers, output_size):
    k = 1.0 / jnp.sqrt(jnp.float32(hidden_size))
    params = {"lstm": []}
    for layer in range(num_layers):
        d_in = input_size if layer == 0 else hidden_size
        key, k1, k2, k3, k4 = jax.random.split(key, 5)
        w_ih = jax.random.uniform(k1, (4 * hidden_size, d_in), jnp.float32, -k, k)
        w_hh = jax.random.uniform(k2, (4 * hidden_size, hidden_size), jnp.float32, -k, k)
        b_ih = jax.random.uniform(k3, (4 * hidden_size,), jnp.float32, -k, k)
        b_hh = jax.random.uniform(k4, (4 * hidden_size,), jnp.float32, -k, k)
        params["lstm"].append({
            "w_ih_t": w_ih.T,                        # (d_in, 4H)
            "w_hh_t": w_hh.T,                        # (H, 4H)
            "b": (b_ih + b_hh)[None, :],             # (1, 4H)
        })
    key, k5, k6 = jax.random.split(key, 3)
    kf = 1.0 / jnp.sqrt(jnp.float32(hidden_size))
    fc_w = jax.random.uniform(k5, (output_size, hidden_size), jnp.float32, -kf, kf)
    fc_b = jax.random.uniform(k6, (output_size,), jnp.float32, -kf, kf)
    params["fc_w_t"] = fc_w.T                        # (H, O)
    params["fc_b"] = fc_b[None, :]                   # (1, O)
    return params


# ----------------------------------------------------------------------------
# Pure-JAX f32 reference for correctness checking (PyTorch nn.LSTM semantics).
# ----------------------------------------------------------------------------
def task_config_ref(x, params):
    h_seq = jnp.transpose(x, (1, 0, 2)).astype(jnp.float32)
    for layer in params["lstm"]:
        w_ih_t, w_hh_t, b = layer["w_ih_t"], layer["w_hh_t"], layer["b"]
        H = w_hh_t.shape[0]
        B = h_seq.shape[1]

        def step(carry, x_t):
            h_prev, c_prev = carry
            gates = x_t @ w_ih_t + h_prev @ w_hh_t + b
            i = jax.nn.sigmoid(gates[:, :H])
            f = jax.nn.sigmoid(gates[:, H:2 * H])
            g = jnp.tanh(gates[:, 2 * H:3 * H])
            o = jax.nn.sigmoid(gates[:, 3 * H:])
            c = f * c_prev + i * g
            hn = o * jnp.tanh(c)
            return (hn, c), hn

        init = (jnp.zeros((B, H), jnp.float32), jnp.zeros((B, H), jnp.float32))
        _, h_seq = jax.lax.scan(step, init, h_seq)
    return h_seq[-1] @ params["fc_w_t"] + params["fc_b"]


if __name__ == "__main__":
    input_size, hidden_size, num_layers, output_size = 8, 32, 2, 4
    batch, seq = 2, 8

    key = jax.random.PRNGKey(0)
    key, pkey, xkey = jax.random.split(key, 3)
    params = init_params(pkey, input_size, hidden_size, num_layers, output_size)
    x = jax.random.normal(xkey, (batch, seq, input_size), jnp.float32)

    out = task_config_forward(x, params)
    out = jax.block_until_ready(out)

    ref = task_config_ref(x, params)
    assert out.shape == (batch, output_size), out.shape
    # Kernel uses bf16 MXU operands (f32 accumulate), so tolerance is slightly
    # looser than a pure-f32 comparison.
    assert jnp.allclose(out, ref, atol=3e-2, rtol=3e-2), (out, ref)

    print("KERNEL_OK")
</pallas_src>

<mosaic_0001>
module attributes {stable_mosaic.version = 11 : i64} {
  func.func @kernel(%arg0: memref<8x8x8xf32, #tpu.memory_space<vmem>>, %arg1: memref<8x128xbf16, #tpu.memory_space<vmem>>, %arg2: memref<32x128xbf16, #tpu.memory_space<vmem>>, %arg3: memref<1x64x128xbf16, #tpu.memory_space<vmem>>, %arg4: memref<2x128xf32, #tpu.memory_space<vmem>>, %arg5: memref<32x4xbf16, #tpu.memory_space<vmem>>, %arg6: memref<1x4xf32, #tpu.memory_space<vmem>>, %arg7: memref<8x4xf32, #tpu.memory_space<vmem>>) attributes {dimension_semantics = [], scalar_prefetch = 0 : i64, scratch_operands = 0 : i64, tpu.core_type = #tpu.core_type<tc>} {
    %c0 = arith.constant 0 : index
    %c0_0 = arith.constant 0 : index
    %0 = vector.load %arg4[%c0, %c0_0] : memref<2x128xf32, #tpu.memory_space<vmem>>, vector<2x128xf32>
    %c0_1 = arith.constant 0 : index
    %c0_2 = arith.constant 0 : index
    %c0_3 = arith.constant 0 : index
    %1 = vector.load %arg0[%c0_1, %c0_2, %c0_3] : memref<8x8x8xf32, #tpu.memory_space<vmem>>, vector<8x8x8xf32>
    %2 = vector.shape_cast %1 : vector<8x8x8xf32> to vector<64x8xf32>
    %3 = arith.truncf %2 : vector<64x8xf32> to vector<64x8xbf16>
    %c0_4 = arith.constant 0 : index
    %c0_5 = arith.constant 0 : index
    %4 = vector.load %arg1[%c0_4, %c0_5] : memref<8x128xbf16, #tpu.memory_space<vmem>>, vector<8x128xbf16>
    %cst = arith.constant dense<0.000000e+00> : vector<64x128xf32>
    %5 = tpu.matmul %3, %4, %cst {dimension_numbers = #tpu.dot_dimension_numbers<[1], [0], [0], [1], [0, 0, 1, 1], [], []>} : vector<64x8xbf16>, vector<8x128xbf16>, vector<64x128xf32> -> vector<64x128xf32>
    %6 = vector.extract_strided_slice %0 {offsets = [0, 0], sizes = [1, 128], strides = [1, 1]} : vector<2x128xf32> to vector<1x128xf32>
    %7 = vector.shape_cast %6 : vector<1x128xf32> to vector<128xf32>
    %8 = vector.shape_cast %7 : vector<128xf32> to vector<1x128xf32>
    %9 = vector.broadcast %8 : vector<1x128xf32> to vector<64x128xf32>
    %10 = arith.addf %5, %9 : vector<64x128xf32>
    %c0_6 = arith.constant 0 : index
    %c0_7 = arith.constant 0 : index
    %11 = vector.load %arg2[%c0_6, %c0_7] : memref<32x128xbf16, #tpu.memory_space<vmem>>, vector<32x128xbf16>
    %c0_8 = arith.constant 0 : index
    %c0_9 = arith.constant 0 : index
    %c0_10 = arith.constant 0 : index
    %12 = vector.load %arg3[%c0_8, %c0_9, %c0_10] : memref<1x64x128xbf16, #tpu.memory_space<vmem>>, vector<1x64x128xbf16>
    %13 = vector.shape_cast %12 : vector<1x64x128xbf16> to vector<64x128xbf16>
    %14 = vector.extract_strided_slice %0 {offsets = [1, 0], sizes = [1, 128], strides = [1, 1]} : vector<2x128xf32> to vector<1x128xf32>
    %15 = vector.shape_cast %14 : vector<1x128xf32> to vector<128xf32>
    %16 = vector.shape_cast %15 : vector<128xf32> to vector<1x128xf32>
    %cst_11 = arith.constant 0.000000e+00 : f32
    %17 = vector.broadcast %cst_11 : f32 to vector<8x32xf32>
    %cst_12 = arith.constant 0.000000e+00 : f32
    %18 = vector.broadcast %cst_12 : f32 to vector<8x32xf32>
    %cst_13 = arith.constant 0.000000e+00 : f32
    %19 = vector.broadcast %cst_13 : f32 to vector<8x32xf32>
    %cst_14 = arith.constant 0.000000e+00 : f32
    %20 = vector.broadcast %cst_14 : f32 to vector<8x32xf32>
    %21 = vector.extract_strided_slice %10 {offsets = [0, 0], sizes = [8, 128], strides = [1, 1]} : vector<64x128xf32> to vector<8x128xf32>
    %22 = arith.truncf %17 : vector<8x32xf32> to vector<8x32xbf16>
    %cst_15 = arith.constant dense<0.000000e+00> : vector<8x128xf32>
    %23 = tpu.matmul %22, %11, %cst_15 {dimension_numbers = #tpu.dot_dimension_numbers<[1], [0], [0], [1], [0, 0, 1, 1], [], []>} : vector<8x32xbf16>, vector<32x128xbf16>, vector<8x128xf32> -> vector<8x128xf32>
    %24 = arith.addf %21, %23 : vector<8x128xf32>
    %25 = vector.extract_strided_slice %24 {offsets = [0, 0], sizes = [8, 32], strides = [1, 1]} : vector<8x128xf32> to vector<8x32xf32>
    %26 = arith.negf %25 : vector<8x32xf32>
    %27 = math.exp %26 : vector<8x32xf32>
    %cst_16 = arith.constant 1.000000e+00 : f32
    %28 = vector.broadcast %cst_16 : f32 to vector<8x32xf32>
    %29 = arith.addf %28, %27 : vector<8x32xf32>
    %30 = arith.divf %28, %29 : vector<8x32xf32>
    %31 = vector.extract_strided_slice %24 {offsets = [0, 32], sizes = [8, 32], strides = [1, 1]} : vector<8x128xf32> to vector<8x32xf32>
    %32 = arith.negf %31 : vector<8x32xf32>
    %33 = math.exp %32 : vector<8x32xf32>
    %cst_17 = arith.constant 1.000000e+00 : f32
    %34 = vector.broadcast %cst_17 : f32 to vector<8x32xf32>
    %35 = arith.addf %34, %33 : vector<8x32xf32>
    %36 = arith.divf %34, %35 : vector<8x32xf32>
    %37 = vector.extract_strided_slice %24 {offsets = [0, 64], sizes = [8, 32], strides = [1, 1]} : vector<8x128xf32> to vector<8x32xf32>
    %38 = math.tanh %37 : vector<8x32xf32>
    %39 = vector.extract_strided_slice %24 {offsets = [0, 96], sizes = [8, 32], strides = [1, 1]} : vector<8x128xf32> to vector<8x32xf32>
    %40 = arith.negf %39 : vector<8x32xf32>
    %41 = math.exp %40 : vector<8x32xf32>
    %cst_18 = arith.constant 1.000000e+00 : f32
    %42 = vector.broadcast %cst_18 : f32 to vector<8x32xf32>
    %43 = arith.addf %42, %41 : vector<8x32xf32>
    %44 = arith.divf %42, %43 : vector<8x32xf32>
    %45 = arith.mulf %36, %19 : vector<8x32xf32>
    %46 = arith.mulf %30, %38 : vector<8x32xf32>
    %47 = arith.addf %45, %46 : vector<8x32xf32>
    %48 = math.tanh %47 : vector<8x32xf32>
    %49 = arith.mulf %44, %48 : vector<8x32xf32>
    %50 = tpu.concatenate %49, %18 in 1 : vector<8x32xf32>, vector<8x32xf32> -> vector<8x64xf32>
    %51 = arith.truncf %50 : vector<8x64xf32> to vector<8x64xbf16>
    %cst_19 = arith.constant dense<0.000000e+00> : vector<8x128xf32>
    %52 = tpu.matmul %51, %13, %cst_19 {dimension_numbers = #tpu.dot_dimension_numbers<[1], [0], [0], [1], [0, 0, 1, 1], [], []>} : vector<8x64xbf16>, vector<64x128xbf16>, vector<8x128xf32> -> vector<8x128xf32>
    %53 = vector.broadcast %16 : vector<1x128xf32> to vector<8x128xf32>
    %54 = arith.addf %52, %53 : vector<8x128xf32>
    %55 = vector.extract_strided_slice %54 {offsets = [0, 0], sizes = [8, 32], strides = [1, 1]} : vector<8x128xf32> to vector<8x32xf32>
    %56 = arith.negf %55 : vector<8x32xf32>
    %57 = math.exp %56 : vector<8x32xf32>
    %cst_20 = arith.constant 1.000000e+00 : f32
    %58 = vector.broadcast %cst_20 : f32 to vector<8x32xf32>
    %59 = arith.addf %58, %57 : vector<8x32xf32>
    %60 = arith.divf %58, %59 : vector<8x32xf32>
    %61 = vector.extract_strided_slice %54 {offsets = [0, 32], sizes = [8, 32], strides = [1, 1]} : vector<8x128xf32> to vector<8x32xf32>
    %62 = arith.negf %61 : vector<8x32xf32>
    %63 = math.exp %62 : vector<8x32xf32>
    %cst_21 = arith.constant 1.000000e+00 : f32
    %64 = vector.broadcast %cst_21 : f32 to vector<8x32xf32>
    %65 = arith.addf %64, %63 : vector<8x32xf32>
    %66 = arith.divf %64, %65 : vector<8x32xf32>
    %67 = vector.extract_strided_slice %54 {offsets = [0, 64], sizes = [8, 32], strides = [1, 1]} : vector<8x128xf32> to vector<8x32xf32>
    %68 = math.tanh %67 : vector<8x32xf32>
    %69 = vector.extract_strided_slice %54 {offsets = [0, 96], sizes = [8, 32], strides = [1, 1]} : vector<8x128xf32> to vector<8x32xf32>
    %70 = arith.negf %69 : vector<8x32xf32>
    %71 = math.exp %70 : vector<8x32xf32>
    %cst_22 = arith.constant 1.000000e+00 : f32
    %72 = vector.broadcast %cst_22 : f32 to vector<8x32xf32>
    %73 = arith.addf %72, %71 : vector<8x32xf32>
    %74 = arith.divf %72, %73 : vector<8x32xf32>
    %75 = arith.mulf %66, %20 : vector<8x32xf32>
    %76 = arith.mulf %60, %68 : vector<8x32xf32>
    %77 = arith.addf %75, %76 : vector<8x32xf32>
    %78 = math.tanh %77 : vector<8x32xf32>
    %79 = arith.mulf %74, %78 : vector<8x32xf32>
    %80 = vector.extract_strided_slice %10 {offsets = [8, 0], sizes = [8, 128], strides = [1, 1]} : vector<64x128xf32> to vector<8x128xf32>
    %81 = arith.truncf %49 : vector<8x32xf32> to vector<8x32xbf16>
    %cst_23 = arith.constant dense<0.000000e+00> : vector<8x128xf32>
    %82 = tpu.matmul %81, %11, %cst_23 {dimension_numbers = #tpu.dot_dimension_numbers<[1], [0], [0], [1], [0, 0, 1, 1], [], []>} : vector<8x32xbf16>, vector<32x128xbf16>, vector<8x128xf32> -> vector<8x128xf32>
    %83 = arith.addf %80, %82 : vector<8x128xf32>
    %84 = vector.extract_strided_slice %83 {offsets = [0, 0], sizes = [8, 32], strides = [1, 1]} : vector<8x128xf32> to vector<8x32xf32>
    %85 = arith.negf %84 : vector<8x32xf32>
    %86 = math.exp %85 : vector<8x32xf32>
    %cst_24 = arith.constant 1.000000e+00 : f32
    %87 = vector.broadcast %cst_24 : f32 to vector<8x32xf32>
    %88 = arith.addf %87, %86 : vector<8x32xf32>
    %89 = arith.divf %87, %88 : vector<8x32xf32>
    %90 = vector.extract_strided_slice %83 {offsets = [0, 32], sizes = [8, 32], strides = [1, 1]} : vector<8x128xf32> to vector<8x32xf32>
    %91 = arith.negf %90 : vector<8x32xf32>
    %92 = math.exp %91 : vector<8x32xf32>
    %cst_25 = arith.constant 1.000000e+00 : f32
    %93 = vector.broadcast %cst_25 : f32 to vector<8x32xf32>
    %94 = arith.addf %93, %92 : vector<8x32xf32>
    %95 = arith.divf %93, %94 : vector<8x32xf32>
    %96 = vector.extract_strided_slice %83 {offsets = [0, 64], sizes = [8, 32], strides = [1, 1]} : vector<8x128xf32> to vector<8x32xf32>
    %97 = math.tanh %96 : vector<8x32xf32>
    %98 = vector.extract_strided_slice %83 {offsets = [0, 96], sizes = [8, 32], strides = [1, 1]} : vector<8x128xf32> to vector<8x32xf32>
    %99 = arith.negf %98 : vector<8x32xf32>
    %100 = math.exp %99 : vector<8x32xf32>
    %cst_26 = arith.constant 1.000000e+00 : f32
    %101 = vector.broadcast %cst_26 : f32 to vector<8x32xf32>
    %102 = arith.addf %101, %100 : vector<8x32xf32>
    %103 = arith.divf %101, %102 : vector<8x32xf32>
    %104 = arith.mulf %95, %47 : vector<8x32xf32>
    %105 = arith.mulf %89, %97 : vector<8x32xf32>
    %106 = arith.addf %104, %105 : vector<8x32xf32>
    %107 = math.tanh %106 : vector<8x32xf32>
    %108 = arith.mulf %103, %107 : vector<8x32xf32>
    %109 = tpu.concatenate %108, %79 in 1 : vector<8x32xf32>, vector<8x32xf32> -> vector<8x64xf32>
    %110 = arith.truncf %109 : vector<8x64xf32> to vector<8x64xbf16>
    %cst_27 = arith.constant dense<0.000000e+00> : vector<8x128xf32>
    %111 = tpu.matmul %110, %13, %cst_27 {dimension_numbers = #tpu.dot_dimension_numbers<[1], [0], [0], [1], [0, 0, 1, 1], [], []>} : vector<8x64xbf16>, vector<64x128xbf16>, vector<8x128xf32> -> vector<8x128xf32>
    %112 = vector.broadcast %16 : vector<1x128xf32> to vector<8x128xf32>
    %113 = arith.addf %111, %112 : vector<8x128xf32>
    %114 = vector.extract_strided_slice %113 {offsets = [0, 0], sizes = [8, 32], strides = [1, 1]} : vector<8x128xf32> to vector<8x32xf32>
    %115 = arith.negf %114 : vector<8x32xf32>
    %116 = math.exp %115 : vector<8x32xf32>
    %cst_28 = arith.constant 1.000000e+00 : f32
    %117 = vector.broadcast %cst_28 : f32 to vector<8x32xf32>
    %118 = arith.addf %117, %116 : vector<8x32xf32>
    %119 = arith.divf %117, %118 : vector<8x32xf32>
    %120 = vector.extract_strided_slice %113 {offsets = [0, 32], sizes = [8, 32], strides = [1, 1]} : vector<8x128xf32> to vector<8x32xf32>
    %121 = arith.negf %120 : vector<8x32xf32>
    %122 = math.exp %121 : vector<8x32xf32>
    %cst_29 = arith.constant 1.000000e+00 : f32
    %123 = vector.broadcast %cst_29 : f32 to vector<8x32xf32>
    %124 = arith.addf %123, %122 : vector<8x32xf32>
    %125 = arith.divf %123, %124 : vector<8x32xf32>
    %126 = vector.extract_strided_slice %113 {offsets = [0, 64], sizes = [8, 32], strides = [1, 1]} : vector<8x128xf32> to vector<8x32xf32>
    %127 = math.tanh %126 : vector<8x32xf32>
    %128 = vector.extract_strided_slice %113 {offsets = [0, 96], sizes = [8, 32], strides = [1, 1]} : vector<8x128xf32> to vector<8x32xf32>
    %129 = arith.negf %128 : vector<8x32xf32>
    %130 = math.exp %129 : vector<8x32xf32>
    %cst_30 = arith.constant 1.000000e+00 : f32
    %131 = vector.broadcast %cst_30 : f32 to vector<8x32xf32>
    %132 = arith.addf %131, %130 : vector<8x32xf32>
    %133 = arith.divf %131, %132 : vector<8x32xf32>
    %134 = arith.mulf %125, %77 : vector<8x32xf32>
    %135 = arith.mulf %119, %127 : vector<8x32xf32>
    %136 = arith.addf %134, %135 : vector<8x32xf32>
    %137 = math.tanh %136 : vector<8x32xf32>
    %138 = arith.mulf %133, %137 : vector<8x32xf32>
    %139 = vector.extract_strided_slice %10 {offsets = [16, 0], sizes = [8, 128], strides = [1, 1]} : vector<64x128xf32> to vector<8x128xf32>
    %140 = arith.truncf %108 : vector<8x32xf32> to vector<8x32xbf16>
    %cst_31 = arith.constant dense<0.000000e+00> : vector<8x128xf32>
    %141 = tpu.matmul %140, %11, %cst_31 {dimension_numbers = #tpu.dot_dimension_numbers<[1], [0], [0], [1], [0, 0, 1, 1], [], []>} : vector<8x32xbf16>, vector<32x128xbf16>, vector<8x128xf32> -> vector<8x128xf32>
    %142 = arith.addf %139, %141 : vector<8x128xf32>
    %143 = vector.extract_strided_slice %142 {offsets = [0, 0], sizes = [8, 32], strides = [1, 1]} : vector<8x128xf32> to vector<8x32xf32>
    %144 = arith.negf %143 : vector<8x32xf32>
    %145 = math.exp %144 : vector<8x32xf32>
    %cst_32 = arith.constant 1.000000e+00 : f32
    %146 = vector.broadcast %cst_32 : f32 to vector<8x32xf32>
    %147 = arith.addf %146, %145 : vector<8x32xf32>
    %148 = arith.divf %146, %147 : vector<8x32xf32>
    %149 = vector.extract_strided_slice %142 {offsets = [0, 32], sizes = [8, 32], strides = [1, 1]} : vector<8x128xf32> to vector<8x32xf32>
    %150 = arith.negf %149 : vector<8x32xf32>
    %151 = math.exp %150 : vector<8x32xf32>
    %cst_33 = arith.constant 1.000000e+00 : f32
    %152 = vector.broadcast %cst_33 : f32 to vector<8x32xf32>
    %153 = arith.addf %152, %151 : vector<8x32xf32>
    %154 = arith.divf %152, %153 : vector<8x32xf32>
    %155 = vector.extract_strided_slice %142 {offsets = [0, 64], sizes = [8, 32], strides = [1, 1]} : vector<8x128xf32> to vector<8x32xf32>
    %156 = math.tanh %155 : vector<8x32xf32>
    %157 = vector.extract_strided_slice %142 {offsets = [0, 96], sizes = [8, 32], strides = [1, 1]} : vector<8x128xf32> to vector<8x32xf32>
    %158 = arith.negf %157 : vector<8x32xf32>
    %159 = math.exp %158 : vector<8x32xf32>
    %cst_34 = arith.constant 1.000000e+00 : f32
    %160 = vector.broadcast %cst_34 : f32 to vector<8x32xf32>
    %161 = arith.addf %160, %159 : vector<8x32xf32>
    %162 = arith.divf %160, %161 : vector<8x32xf32>
    %163 = arith.mulf %154, %106 : vector<8x32xf32>
    %164 = arith.mulf %148, %156 : vector<8x32xf32>
    %165 = arith.addf %163, %164 : vector<8x32xf32>
    %166 = math.tanh %165 : vector<8x32xf32>
    %167 = arith.mulf %162, %166 : vector<8x32xf32>
    %168 = tpu.concatenate %167, %138 in 1 : vector<8x32xf32>, vector<8x32xf32> -> vector<8x64xf32>
    %169 = arith.truncf %168 : vector<8x64xf32> to vector<8x64xbf16>
    %cst_35 = arith.constant dense<0.000000e+00> : vector<8x128xf32>
    %170 = tpu.matmul %169, %13, %cst_35 {dimension_numbers = #tpu.dot_dimension_numbers<[1], [0], [0], [1], [0, 0, 1, 1], [], []>} : vector<8x64xbf16>, vector<64x128xbf16>, vector<8x128xf32> -> vector<8x128xf32>
    %171 = vector.broadcast %16 : vector<1x128xf32> to vector<8x128xf32>
    %172 = arith.addf %170, %171 : vector<8x128xf32>
    %173 = vector.extract_strided_slice %172 {offsets = [0, 0], sizes = [8, 32], strides = [1, 1]} : vector<8x128xf32> to vector<8x32xf32>
    %174 = arith.negf %173 : vector<8x32xf32>
    %175 = math.exp %174 : vector<8x32xf32>
    %cst_36 = arith.constant 1.000000e+00 : f32
    %176 = vector.broadcast %cst_36 : f32 to vector<8x32xf32>
    %177 = arith.addf %176, %175 : vector<8x32xf32>
    %178 = arith.divf %176, %177 : vector<8x32xf32>
    %179 = vector.extract_strided_slice %172 {offsets = [0, 32], sizes = [8, 32], strides = [1, 1]} : vector<8x128xf32> to vector<8x32xf32>
    %180 = arith.negf %179 : vector<8x32xf32>
    %181 = math.exp %180 : vector<8x32xf32>
    %cst_37 = arith.constant 1.000000e+00 : f32
    %182 = vector.broadcast %cst_37 : f32 to vector<8x32xf32>
    %183 = arith.addf %182, %181 : vector<8x32xf32>
    %184 = arith.divf %182, %183 : vector<8x32xf32>
    %185 = vector.extract_strided_slice %172 {offsets = [0, 64], sizes = [8, 32], strides = [1, 1]} : vector<8x128xf32> to vector<8x32xf32>
    %186 = math.tanh %185 : vector<8x32xf32>
    %187 = vector.extract_strided_slice %172 {offsets = [0, 96], sizes = [8, 32], strides = [1, 1]} : vector<8x128xf32> to vector<8x32xf32>
    %188 = arith.negf %187 : vector<8x32xf32>
    %189 = math.exp %188 : vector<8x32xf32>
    %cst_38 = arith.constant 1.000000e+00 : f32
    %190 = vector.broadcast %cst_38 : f32 to vector<8x32xf32>
    %191 = arith.addf %190, %189 : vector<8x32xf32>
    %192 = arith.divf %190, %191 : vector<8x32xf32>
    %193 = arith.mulf %184, %136 : vector<8x32xf32>
    %194 = arith.mulf %178, %186 : vector<8x32xf32>
    %195 = arith.addf %193, %194 : vector<8x32xf32>
    %196 = math.tanh %195 : vector<8x32xf32>
    %197 = arith.mulf %192, %196 : vector<8x32xf32>
    %198 = vector.extract_strided_slice %10 {offsets = [24, 0], sizes = [8, 128], strides = [1, 1]} : vector<64x128xf32> to vector<8x128xf32>
    %199 = arith.truncf %167 : vector<8x32xf32> to vector<8x32xbf16>
    %cst_39 = arith.constant dense<0.000000e+00> : vector<8x128xf32>
    %200 = tpu.matmul %199, %11, %cst_39 {dimension_numbers = #tpu.dot_dimension_numbers<[1], [0], [0], [1], [0, 0, 1, 1], [], []>} : vector<8x32xbf16>, vector<32x128xbf16>, vector<8x128xf32> -> vector<8x128xf32>
    %201 = arith.addf %198, %200 : vector<8x128xf32>
    %202 = vector.extract_strided_slice %201 {offsets = [0, 0], sizes = [8, 32], strides = [1, 1]} : vector<8x128xf32> to vector<8x32xf32>
    %203 = arith.negf %202 : vector<8x32xf32>
    %204 = math.exp %203 : vector<8x32xf32>
    %cst_40 = arith.constant 1.000000e+00 : f32
    %205 = vector.broadcast %cst_40 : f32 to vector<8x32xf32>
    %206 = arith.addf %205, %204 : vector<8x32xf32>
    %207 = arith.divf %205, %206 : vector<8x32xf32>
    %208 = vector.extract_strided_slice %201 {offsets = [0, 32], sizes = [8, 32], strides = [1, 1]} : vector<8x128xf32> to vector<8x32xf32>
    %209 = arith.negf %208 : vector<8x32xf32>
    %210 = math.exp %209 : vector<8x32xf32>
    %cst_41 = arith.constant 1.000000e+00 : f32
    %211 = vector.broadcast %cst_41 : f32 to vector<8x32xf32>
    %212 = arith.addf %211, %210 : vector<8x32xf32>
    %213 = arith.divf %211, %212 : vector<8x32xf32>
    %214 = vector.extract_strided_slice %201 {offsets = [0, 64], sizes = [8, 32], strides = [1, 1]} : vector<8x128xf32> to vector<8x32xf32>
    %215 = math.tanh %214 : vector<8x32xf32>
    %216 = vector.extract_strided_slice %201 {offsets = [0, 96], sizes = [8, 32], strides = [1, 1]} : vector<8x128xf32> to vector<8x32xf32>
    %217 = arith.negf %216 : vector<8x32xf32>
    %218 = math.exp %217 : vector<8x32xf32>
    %cst_42 = arith.constant 1.000000e+00 : f32
    %219 = vector.broadcast %cst_42 : f32 to vector<8x32xf32>
    %220 = arith.addf %219, %218 : vector<8x32xf32>
    %221 = arith.divf %219, %220 : vector<8x32xf32>
    %222 = arith.mulf %213, %165 : vector<8x32xf32>
    %223 = arith.mulf %207, %215 : vector<8x32xf32>
    %224 = arith.addf %222, %223 : vector<8x32xf32>
    %225 = math.tanh %224 : vector<8x32xf32>
    %226 = arith.mulf %221, %225 : vector<8x32xf32>
    %227 = tpu.concatenate %226, %197 in 1 : vector<8x32xf32>, vector<8x32xf32> -> vector<8x64xf32>
    %228 = arith.truncf %227 : vector<8x64xf32> to vector<8x64xbf16>
    %cst_43 = arith.constant dense<0.000000e+00> : vector<8x128xf32>
    %229 = tpu.matmul %228, %13, %cst_43 {dimension_numbers = #tpu.dot_dimension_numbers<[1], [0], [0], [1], [0, 0, 1, 1], [], []>} : vector<8x64xbf16>, vector<64x128xbf16>, vector<8x128xf32> -> vector<8x128xf32>
    %230 = vector.broadcast %16 : vector<1x128xf32> to vector<8x128xf32>
    %231 = arith.addf %229, %230 : vector<8x128xf32>
    %232 = vector.extract_strided_slice %231 {offsets = [0, 0], sizes = [8, 32], strides = [1, 1]} : vector<8x128xf32> to vector<8x32xf32>
    %233 = arith.negf %232 : vector<8x32xf32>
    %234 = math.exp %233 : vector<8x32xf32>
    %cst_44 = arith.constant 1.000000e+00 : f32
    %235 = vector.broadcast %cst_44 : f32 to vector<8x32xf32>
    %236 = arith.addf %235, %234 : vector<8x32xf32>
    %237 = arith.divf %235, %236 : vector<8x32xf32>
    %238 = vector.extract_strided_slice %231 {offsets = [0, 32], sizes = [8, 32], strides = [1, 1]} : vector<8x128xf32> to vector<8x32xf32>
    %239 = arith.negf %238 : vector<8x32xf32>
    %240 = math.exp %239 : vector<8x32xf32>
    %cst_45 = arith.constant 1.000000e+00 : f32
    %241 = vector.broadcast %cst_45 : f32 to vector<8x32xf32>
    %242 = arith.addf %241, %240 : vector<8x32xf32>
    %243 = arith.divf %241, %242 : vector<8x32xf32>
    %244 = vector.extract_strided_slice %231 {offsets = [0, 64], sizes = [8, 32], strides = [1, 1]} : vector<8x128xf32> to vector<8x32xf32>
    %245 = math.tanh %244 : vector<8x32xf32>
    %246 = vector.extract_strided_slice %231 {offsets = [0, 96], sizes = [8, 32], strides = [1, 1]} : vector<8x128xf32> to vector<8x32xf32>
    %247 = arith.negf %246 : vector<8x32xf32>
    %248 = math.exp %247 : vector<8x32xf32>
    %cst_46 = arith.constant 1.000000e+00 : f32
    %249 = vector.broadcast %cst_46 : f32 to vector<8x32xf32>
    %250 = arith.addf %249, %248 : vector<8x32xf32>
    %251 = arith.divf %249, %250 : vector<8x32xf32>
    %252 = arith.mulf %243, %195 : vector<8x32xf32>
    %253 = arith.mulf %237, %245 : vector<8x32xf32>
    %254 = arith.addf %252, %253 : vector<8x32xf32>
    %255 = math.tanh %254 : vector<8x32xf32>
    %256 = arith.mulf %251, %255 : vector<8x32xf32>
    %257 = vector.extract_strided_slice %10 {offsets = [32, 0], sizes = [8, 128], strides = [1, 1]} : vector<64x128xf32> to vector<8x128xf32>
    %258 = arith.truncf %226 : vector<8x32xf32> to vector<8x32xbf16>
    %cst_47 = arith.constant dense<0.000000e+00> : vector<8x128xf32>
    %259 = tpu.matmul %258, %11, %cst_47 {dimension_numbers = #tpu.dot_dimension_numbers<[1], [0], [0], [1], [0, 0, 1, 1], [], []>} : vector<8x32xbf16>, vector<32x128xbf16>, vector<8x128xf32> -> vector<8x128xf32>
    %260 = arith.addf %257, %259 : vector<8x128xf32>
    %261 = vector.extract_strided_slice %260 {offsets = [0, 0], sizes = [8, 32], strides = [1, 1]} : vector<8x128xf32> to vector<8x32xf32>
    %262 = arith.negf %261 : vector<8x32xf32>
    %263 = math.exp %262 : vector<8x32xf32>
    %cst_48 = arith.constant 1.000000e+00 : f32
    %264 = vector.broadcast %cst_48 : f32 to vector<8x32xf32>
    %265 = arith.addf %264, %263 : vector<8x32xf32>
    %266 = arith.divf %264, %265 : vector<8x32xf32>
    %267 = vector.extract_strided_slice %260 {offsets = [0, 32], sizes = [8, 32], strides = [1, 1]} : vector<8x128xf32> to vector<8x32xf32>
    %268 = arith.negf %267 : vector<8x32xf32>
    %269 = math.exp %268 : vector<8x32xf32>
    %cst_49 = arith.constant 1.000000e+00 : f32
    %270 = vector.broadcast %cst_49 : f32 to vector<8x32xf32>
    %271 = arith.addf %270, %269 : vector<8x32xf32>
    %272 = arith.divf %270, %271 : vector<8x32xf32>
    %273 = vector.extract_strided_slice %260 {offsets = [0, 64], sizes = [8, 32], strides = [1, 1]} : vector<8x128xf32> to vector<8x32xf32>
    %274 = math.tanh %273 : vector<8x32xf32>
    %275 = vector.extract_strided_slice %260 {offsets = [0, 96], sizes = [8, 32], strides = [1, 1]} : vector<8x128xf32> to vector<8x32xf32>
    %276 = arith.negf %275 : vector<8x32xf32>
    %277 = math.exp %276 : vector<8x32xf32>
    %cst_50 = arith.constant 1.000000e+00 : f32
    %278 = vector.broadcast %cst_50 : f32 to vector<8x32xf32>
    %279 = arith.addf %278, %277 : vector<8x32xf32>
    %280 = arith.divf %278, %279 : vector<8x32xf32>
    %281 = arith.mulf %272, %224 : vector<8x32xf32>
    %282 = arith.mulf %266, %274 : vector<8x32xf32>
    %283 = arith.addf %281, %282 : vector<8x32xf32>
    %284 = math.tanh %283 : vector<8x32xf32>
    %285 = arith.mulf %280, %284 : vector<8x32xf32>
    %286 = tpu.concatenate %285, %256 in 1 : vector<8x32xf32>, vector<8x32xf32> -> vector<8x64xf32>
    %287 = arith.truncf %286 : vector<8x64xf32> to vector<8x64xbf16>
    %cst_51 = arith.constant dense<0.000000e+00> : vector<8x128xf32>
    %288 = tpu.matmul %287, %13, %cst_51 {dimension_numbers = #tpu.dot_dimension_numbers<[1], [0], [0], [1], [0, 0, 1, 1], [], []>} : vector<8x64xbf16>, vector<64x128xbf16>, vector<8x128xf32> -> vector<8x128xf32>
    %289 = vector.broadcast %16 : vector<1x128xf32> to vector<8x128xf32>
    %290 = arith.addf %288, %289 : vector<8x128xf32>
    %291 = vector.extract_strided_slice %290 {offsets = [0, 0], sizes = [8, 32], strides = [1, 1]} : vector<8x128xf32> to vector<8x32xf32>
    %292 = arith.negf %291 : vector<8x32xf32>
    %293 = math.exp %292 : vector<8x32xf32>
    %cst_52 = arith.constant 1.000000e+00 : f32
    %294 = vector.broadcast %cst_52 : f32 to vector<8x32xf32>
    %295 = arith.addf %294, %293 : vector<8x32xf32>
    %296 = arith.divf %294, %295 : vector<8x32xf32>
    %297 = vector.extract_strided_slice %290 {offsets = [0, 32], sizes = [8, 32], strides = [1, 1]} : vector<8x128xf32> to vector<8x32xf32>
    %298 = arith.negf %297 : vector<8x32xf32>
    %299 = math.exp %298 : vector<8x32xf32>
    %cst_53 = arith.constant 1.000000e+00 : f32
    %300 = vector.broadcast %cst_53 : f32 to vector<8x32xf32>
    %301 = arith.addf %300, %299 : vector<8x32xf32>
    %302 = arith.divf %300, %301 : vector<8x32xf32>
    %303 = vector.extract_strided_slice %290 {offsets = [0, 64], sizes = [8, 32], strides = [1, 1]} : vector<8x128xf32> to vector<8x32xf32>
    %304 = math.tanh %303 : vector<8x32xf32>
    %305 = vector.extract_strided_slice %290 {offsets = [0, 96], sizes = [8, 32], strides = [1, 1]} : vector<8x128xf32> to vector<8x32xf32>
    %306 = arith.negf %305 : vector<8x32xf32>
    %307 = math.exp %306 : vector<8x32xf32>
    %cst_54 = arith.constant 1.000000e+00 : f32
    %308 = vector.broadcast %cst_54 : f32 to vector<8x32xf32>
    %309 = arith.addf %308, %307 : vector<8x32xf32>
    %310 = arith.divf %308, %309 : vector<8x32xf32>
    %311 = arith.mulf %302, %254 : vector<8x32xf32>
    %312 = arith.mulf %296, %304 : vector<8x32xf32>
    %313 = arith.addf %311, %312 : vector<8x32xf32>
    %314 = math.tanh %313 : vector<8x32xf32>
    %315 = arith.mulf %310, %314 : vector<8x32xf32>
    %316 = vector.extract_strided_slice %10 {offsets = [40, 0], sizes = [8, 128], strides = [1, 1]} : vector<64x128xf32> to vector<8x128xf32>
    %317 = arith.truncf %285 : vector<8x32xf32> to vector<8x32xbf16>
    %cst_55 = arith.constant dense<0.000000e+00> : vector<8x128xf32>
    %318 = tpu.matmul %317, %11, %cst_55 {dimension_numbers = #tpu.dot_dimension_numbers<[1], [0], [0], [1], [0, 0, 1, 1], [], []>} : vector<8x32xbf16>, vector<32x128xbf16>, vector<8x128xf32> -> vector<8x128xf32>
    %319 = arith.addf %316, %318 : vector<8x128xf32>
    %320 = vector.extract_strided_slice %319 {offsets = [0, 0], sizes = [8, 32], strides = [1, 1]} : vector<8x128xf32> to vector<8x32xf32>
    %321 = arith.negf %320 : vector<8x32xf32>
    %322 = math.exp %321 : vector<8x32xf32>
    %cst_56 = arith.constant 1.000000e+00 : f32
    %323 = vector.broadcast %cst_56 : f32 to vector<8x32xf32>
    %324 = arith.addf %323, %322 : vector<8x32xf32>
    %325 = arith.divf %323, %324 : vector<8x32xf32>
    %326 = vector.extract_strided_slice %319 {offsets = [0, 32], sizes = [8, 32], strides = [1, 1]} : vector<8x128xf32> to vector<8x32xf32>
    %327 = arith.negf %326 : vector<8x32xf32>
    %328 = math.exp %327 : vector<8x32xf32>
    %cst_57 = arith.constant 1.000000e+00 : f32
    %329 = vector.broadcast %cst_57 : f32 to vector<8x32xf32>
    %330 = arith.addf %329, %328 : vector<8x32xf32>
    %331 = arith.divf %329, %330 : vector<8x32xf32>
    %332 = vector.extract_strided_slice %319 {offsets = [0, 64], sizes = [8, 32], strides = [1, 1]} : vector<8x128xf32> to vector<8x32xf32>
    %333 = math.tanh %332 : vector<8x32xf32>
    %334 = vector.extract_strided_slice %319 {offsets = [0, 96], sizes = [8, 32], strides = [1, 1]} : vector<8x128xf32> to vector<8x32xf32>
    %335 = arith.negf %334 : vector<8x32xf32>
    %336 = math.exp %335 : vector<8x32xf32>
    %cst_58 = arith.constant 1.000000e+00 : f32
    %337 = vector.broadcast %cst_58 : f32 to vector<8x32xf32>
    %338 = arith.addf %337, %336 : vector<8x32xf32>
    %339 = arith.divf %337, %338 : vector<8x32xf32>
    %340 = arith.mulf %331, %283 : vector<8x32xf32>
    %341 = arith.mulf %325, %333 : vector<8x32xf32>
    %342 = arith.addf %340, %341 : vector<8x32xf32>
    %343 = math.tanh %342 : vector<8x32xf32>
    %344 = arith.mulf %339, %343 : vector<8x32xf32>
    %345 = tpu.concatenate %344, %315 in 1 : vector<8x32xf32>, vector<8x32xf32> -> vector<8x64xf32>
    %346 = arith.truncf %345 : vector<8x64xf32> to vector<8x64xbf16>
    %cst_59 = arith.constant dense<0.000000e+00> : vector<8x128xf32>
    %347 = tpu.matmul %346, %13, %cst_59 {dimension_numbers = #tpu.dot_dimension_numbers<[1], [0], [0], [1], [0, 0, 1, 1], [], []>} : vector<8x64xbf16>, vector<64x128xbf16>, vector<8x128xf32> -> vector<8x128xf32>
    %348 = vector.broadcast %16 : vector<1x128xf32> to vector<8x128xf32>
    %349 = arith.addf %347, %348 : vector<8x128xf32>
    %350 = vector.extract_strided_slice %349 {offsets = [0, 0], sizes = [8, 32], strides = [1, 1]} : vector<8x128xf32> to vector<8x32xf32>
    %351 = arith.negf %350 : vector<8x32xf32>
    %352 = math.exp %351 : vector<8x32xf32>
    %cst_60 = arith.constant 1.000000e+00 : f32
    %353 = vector.broadcast %cst_60 : f32 to vector<8x32xf32>
    %354 = arith.addf %353, %352 : vector<8x32xf32>
    %355 = arith.divf %353, %354 : vector<8x32xf32>
    %356 = vector.extract_strided_slice %349 {offsets = [0, 32], sizes = [8, 32], strides = [1, 1]} : vector<8x128xf32> to vector<8x32xf32>
    %357 = arith.negf %356 : vector<8x32xf32>
    %358 = math.exp %357 : vector<8x32xf32>
    %cst_61 = arith.constant 1.000000e+00 : f32
    %359 = vector.broadcast %cst_61 : f32 to vector<8x32xf32>
    %360 = arith.addf %359, %358 : vector<8x32xf32>
    %361 = arith.divf %359, %360 : vector<8x32xf32>
    %362 = vector.extract_strided_slice %349 {offsets = [0, 64], sizes = [8, 32], strides = [1, 1]} : vector<8x128xf32> to vector<8x32xf32>
    %363 = math.tanh %362 : vector<8x32xf32>
    %364 = vector.extract_strided_slice %349 {offsets = [0, 96], sizes = [8, 32], strides = [1, 1]} : vector<8x128xf32> to vector<8x32xf32>
    %365 = arith.negf %364 : vector<8x32xf32>
    %366 = math.exp %365 : vector<8x32xf32>
    %cst_62 = arith.constant 1.000000e+00 : f32
    %367 = vector.broadcast %cst_62 : f32 to vector<8x32xf32>
    %368 = arith.addf %367, %366 : vector<8x32xf32>
    %369 = arith.divf %367, %368 : vector<8x32xf32>
    %370 = arith.mulf %361, %313 : vector<8x32xf32>
    %371 = arith.mulf %355, %363 : vector<8x32xf32>
    %372 = arith.addf %370, %371 : vector<8x32xf32>
    %373 = math.tanh %372 : vector<8x32xf32>
    %374 = arith.mulf %369, %373 : vector<8x32xf32>
    %375 = vector.extract_strided_slice %10 {offsets = [48, 0], sizes = [8, 128], strides = [1, 1]} : vector<64x128xf32> to vector<8x128xf32>
    %376 = arith.truncf %344 : vector<8x32xf32> to vector<8x32xbf16>
    %cst_63 = arith.constant dense<0.000000e+00> : vector<8x128xf32>
    %377 = tpu.matmul %376, %11, %cst_63 {dimension_numbers = #tpu.dot_dimension_numbers<[1], [0], [0], [1], [0, 0, 1, 1], [], []>} : vector<8x32xbf16>, vector<32x128xbf16>, vector<8x128xf32> -> vector<8x128xf32>
    %378 = arith.addf %375, %377 : vector<8x128xf32>
    %379 = vector.extract_strided_slice %378 {offsets = [0, 0], sizes = [8, 32], strides = [1, 1]} : vector<8x128xf32> to vector<8x32xf32>
    %380 = arith.negf %379 : vector<8x32xf32>
    %381 = math.exp %380 : vector<8x32xf32>
    %cst_64 = arith.constant 1.000000e+00 : f32
    %382 = vector.broadcast %cst_64 : f32 to vector<8x32xf32>
    %383 = arith.addf %382, %381 : vector<8x32xf32>
    %384 = arith.divf %382, %383 : vector<8x32xf32>
    %385 = vector.extract_strided_slice %378 {offsets = [0, 32], sizes = [8, 32], strides = [1, 1]} : vector<8x128xf32> to vector<8x32xf32>
    %386 = arith.negf %385 : vector<8x32xf32>
    %387 = math.exp %386 : vector<8x32xf32>
    %cst_65 = arith.constant 1.000000e+00 : f32
    %388 = vector.broadcast %cst_65 : f32 to vector<8x32xf32>
    %389 = arith.addf %388, %387 : vector<8x32xf32>
    %390 = arith.divf %388, %389 : vector<8x32xf32>
    %391 = vector.extract_strided_slice %378 {offsets = [0, 64], sizes = [8, 32], strides = [1, 1]} : vector<8x128xf32> to vector<8x32xf32>
    %392 = math.tanh %391 : vector<8x32xf32>
    %393 = vector.extract_strided_slice %378 {offsets = [0, 96], sizes = [8, 32], strides = [1, 1]} : vector<8x128xf32> to vector<8x32xf32>
    %394 = arith.negf %393 : vector<8x32xf32>
    %395 = math.exp %394 : vector<8x32xf32>
    %cst_66 = arith.constant 1.000000e+00 : f32
    %396 = vector.broadcast %cst_66 : f32 to vector<8x32xf32>
    %397 = arith.addf %396, %395 : vector<8x32xf32>
    %398 = arith.divf %396, %397 : vector<8x32xf32>
    %399 = arith.mulf %390, %342 : vector<8x32xf32>
    %400 = arith.mulf %384, %392 : vector<8x32xf32>
    %401 = arith.addf %399, %400 : vector<8x32xf32>
    %402 = math.tanh %401 : vector<8x32xf32>
    %403 = arith.mulf %398, %402 : vector<8x32xf32>
    %404 = tpu.concatenate %403, %374 in 1 : vector<8x32xf32>, vector<8x32xf32> -> vector<8x64xf32>
    %405 = arith.truncf %404 : vector<8x64xf32> to vector<8x64xbf16>
    %cst_67 = arith.constant dense<0.000000e+00> : vector<8x128xf32>
    %406 = tpu.matmul %405, %13, %cst_67 {dimension_numbers = #tpu.dot_dimension_numbers<[1], [0], [0], [1], [0, 0, 1, 1], [], []>} : vector<8x64xbf16>, vector<64x128xbf16>, vector<8x128xf32> -> vector<8x128xf32>
    %407 = vector.broadcast %16 : vector<1x128xf32> to vector<8x128xf32>
    %408 = arith.addf %406, %407 : vector<8x128xf32>
    %409 = vector.extract_strided_slice %408 {offsets = [0, 0], sizes = [8, 32], strides = [1, 1]} : vector<8x128xf32> to vector<8x32xf32>
    %410 = arith.negf %409 : vector<8x32xf32>
    %411 = math.exp %410 : vector<8x32xf32>
    %cst_68 = arith.constant 1.000000e+00 : f32
    %412 = vector.broadcast %cst_68 : f32 to vector<8x32xf32>
    %413 = arith.addf %412, %411 : vector<8x32xf32>
    %414 = arith.divf %412, %413 : vector<8x32xf32>
    %415 = vector.extract_strided_slice %408 {offsets = [0, 32], sizes = [8, 32], strides = [1, 1]} : vector<8x128xf32> to vector<8x32xf32>
    %416 = arith.negf %415 : vector<8x32xf32>
    %417 = math.exp %416 : vector<8x32xf32>
    %cst_69 = arith.constant 1.000000e+00 : f32
    %418 = vector.broadcast %cst_69 : f32 to vector<8x32xf32>
    %419 = arith.addf %418, %417 : vector<8x32xf32>
    %420 = arith.divf %418, %419 : vector<8x32xf32>
    %421 = vector.extract_strided_slice %408 {offsets = [0, 64], sizes = [8, 32], strides = [1, 1]} : vector<8x128xf32> to vector<8x32xf32>
    %422 = math.tanh %421 : vector<8x32xf32>
    %423 = vector.extract_strided_slice %408 {offsets = [0, 96], sizes = [8, 32], strides = [1, 1]} : vector<8x128xf32> to vector<8x32xf32>
    %424 = arith.negf %423 : vector<8x32xf32>
    %425 = math.exp %424 : vector<8x32xf32>
    %cst_70 = arith.constant 1.000000e+00 : f32
    %426 = vector.broadcast %cst_70 : f32 to vector<8x32xf32>
    %427 = arith.addf %426, %425 : vector<8x32xf32>
    %428 = arith.divf %426, %427 : vector<8x32xf32>
    %429 = arith.mulf %420, %372 : vector<8x32xf32>
    %430 = arith.mulf %414, %422 : vector<8x32xf32>
    %431 = arith.addf %429, %430 : vector<8x32xf32>
    %432 = math.tanh %431 : vector<8x32xf32>
    %433 = arith.mulf %428, %432 : vector<8x32xf32>
    %434 = vector.extract_strided_slice %10 {offsets = [56, 0], sizes = [8, 128], strides = [1, 1]} : vector<64x128xf32> to vector<8x128xf32>
    %435 = arith.truncf %403 : vector<8x32xf32> to vector<8x32xbf16>
    %cst_71 = arith.constant dense<0.000000e+00> : vector<8x128xf32>
    %436 = tpu.matmul %435, %11, %cst_71 {dimension_numbers = #tpu.dot_dimension_numbers<[1], [0], [0], [1], [0, 0, 1, 1], [], []>} : vector<8x32xbf16>, vector<32x128xbf16>, vector<8x128xf32> -> vector<8x128xf32>
    %437 = arith.addf %434, %436 : vector<8x128xf32>
    %438 = vector.extract_strided_slice %437 {offsets = [0, 0], sizes = [8, 32], strides = [1, 1]} : vector<8x128xf32> to vector<8x32xf32>
    %439 = arith.negf %438 : vector<8x32xf32>
    %440 = math.exp %439 : vector<8x32xf32>
    %cst_72 = arith.constant 1.000000e+00 : f32
    %441 = vector.broadcast %cst_72 : f32 to vector<8x32xf32>
    %442 = arith.addf %441, %440 : vector<8x32xf32>
    %443 = arith.divf %441, %442 : vector<8x32xf32>
    %444 = vector.extract_strided_slice %437 {offsets = [0, 32], sizes = [8, 32], strides = [1, 1]} : vector<8x128xf32> to vector<8x32xf32>
    %445 = arith.negf %444 : vector<8x32xf32>
    %446 = math.exp %445 : vector<8x32xf32>
    %cst_73 = arith.constant 1.000000e+00 : f32
    %447 = vector.broadcast %cst_73 : f32 to vector<8x32xf32>
    %448 = arith.addf %447, %446 : vector<8x32xf32>
    %449 = arith.divf %447, %448 : vector<8x32xf32>
    %450 = vector.extract_strided_slice %437 {offsets = [0, 64], sizes = [8, 32], strides = [1, 1]} : vector<8x128xf32> to vector<8x32xf32>
    %451 = math.tanh %450 : vector<8x32xf32>
    %452 = vector.extract_strided_slice %437 {offsets = [0, 96], sizes = [8, 32], strides = [1, 1]} : vector<8x128xf32> to vector<8x32xf32>
    %453 = arith.negf %452 : vector<8x32xf32>
    %454 = math.exp %453 : vector<8x32xf32>
    %cst_74 = arith.constant 1.000000e+00 : f32
    %455 = vector.broadcast %cst_74 : f32 to vector<8x32xf32>
    %456 = arith.addf %455, %454 : vector<8x32xf32>
    %457 = arith.divf %455, %456 : vector<8x32xf32>
    %458 = arith.mulf %449, %401 : vector<8x32xf32>
    %459 = arith.mulf %443, %451 : vector<8x32xf32>
    %460 = arith.addf %458, %459 : vector<8x32xf32>
    %461 = math.tanh %460 : vector<8x32xf32>
    %462 = arith.mulf %457, %461 : vector<8x32xf32>
    %463 = tpu.concatenate %462, %433 in 1 : vector<8x32xf32>, vector<8x32xf32> -> vector<8x64xf32>
    %464 = arith.truncf %463 : vector<8x64xf32> to vector<8x64xbf16>
    %cst_75 = arith.constant dense<0.000000e+00> : vector<8x128xf32>
    %465 = tpu.matmul %464, %13, %cst_75 {dimension_numbers = #tpu.dot_dimension_numbers<[1], [0], [0], [1], [0, 0, 1, 1], [], []>} : vector<8x64xbf16>, vector<64x128xbf16>, vector<8x128xf32> -> vector<8x128xf32>
    %466 = vector.broadcast %16 : vector<1x128xf32> to vector<8x128xf32>
    %467 = arith.addf %465, %466 : vector<8x128xf32>
    %468 = vector.extract_strided_slice %467 {offsets = [0, 0], sizes = [8, 32], strides = [1, 1]} : vector<8x128xf32> to vector<8x32xf32>
    %469 = arith.negf %468 : vector<8x32xf32>
    %470 = math.exp %469 : vector<8x32xf32>
    %cst_76 = arith.constant 1.000000e+00 : f32
    %471 = vector.broadcast %cst_76 : f32 to vector<8x32xf32>
    %472 = arith.addf %471, %470 : vector<8x32xf32>
    %473 = arith.divf %471, %472 : vector<8x32xf32>
    %474 = vector.extract_strided_slice %467 {offsets = [0, 32], sizes = [8, 32], strides = [1, 1]} : vector<8x128xf32> to vector<8x32xf32>
    %475 = arith.negf %474 : vector<8x32xf32>
    %476 = math.exp %475 : vector<8x32xf32>
    %cst_77 = arith.constant 1.000000e+00 : f32
    %477 = vector.broadcast %cst_77 : f32 to vector<8x32xf32>
    %478 = arith.addf %477, %476 : vector<8x32xf32>
    %479 = arith.divf %477, %478 : vector<8x32xf32>
    %480 = vector.extract_strided_slice %467 {offsets = [0, 64], sizes = [8, 32], strides = [1, 1]} : vector<8x128xf32> to vector<8x32xf32>
    %481 = math.tanh %480 : vector<8x32xf32>
    %482 = vector.extract_strided_slice %467 {offsets = [0, 96], sizes = [8, 32], strides = [1, 1]} : vector<8x128xf32> to vector<8x32xf32>
    %483 = arith.negf %482 : vector<8x32xf32>
    %484 = math.exp %483 : vector<8x32xf32>
    %cst_78 = arith.constant 1.000000e+00 : f32
    %485 = vector.broadcast %cst_78 : f32 to vector<8x32xf32>
    %486 = arith.addf %485, %484 : vector<8x32xf32>
    %487 = arith.divf %485, %486 : vector<8x32xf32>
    %488 = arith.mulf %479, %431 : vector<8x32xf32>
    %489 = arith.mulf %473, %481 : vector<8x32xf32>
    %490 = arith.addf %488, %489 : vector<8x32xf32>
    %491 = math.tanh %490 : vector<8x32xf32>
    %492 = arith.mulf %487, %491 : vector<8x32xf32>
    %493 = arith.truncf %492 : vector<8x32xf32> to vector<8x32xbf16>
    %c0_79 = arith.constant 0 : index
    %c0_80 = arith.constant 0 : index
    %494 = vector.load %arg5[%c0_79, %c0_80] : memref<32x4xbf16, #tpu.memory_space<vmem>>, vector<32x4xbf16>
    %cst_81 = arith.constant dense<0.000000e+00> : vector<8x4xf32>
    %495 = tpu.matmul %493, %494, %cst_81 {dimension_numbers = #tpu.dot_dimension_numbers<[1], [0], [0], [1], [0, 0, 1, 1], [], []>} : vector<8x32xbf16>, vector<32x4xbf16>, vector<8x4xf32> -> vector<8x4xf32>
    %c0_82 = arith.constant 0 : index
    %c0_83 = arith.constant 0 : index
    %496 = vector.load %arg6[%c0_82, %c0_83] : memref<1x4xf32, #tpu.memory_space<vmem>>, vector<1x4xf32>
    %497 = vector.broadcast %496 : vector<1x4xf32> to vector<8x4xf32>
    %498 = arith.addf %495, %497 : vector<8x4xf32>
    %c0_84 = arith.constant 0 : index
    %c0_85 = arith.constant 0 : index
    %499 = vector.load %arg7[%c0_84, %c0_85] : memref<8x4xf32, #tpu.memory_space<vmem>>, vector<8x4xf32>
    tpu.vector_store %arg7[%c0_84, %c0_85], %498 {strides = array<i32>} : memref<8x4xf32, #tpu.memory_space<vmem>>, vector<8x4xf32>,
    return
  }
}

</mosaic_0001>

<bundles_post_ra>
// kernel: task_config_forward.1
= control target key start
LH: loop header
LB: loop body
LE: loop exit
PB: predicated region body
PF: predicated region fallthrough
CT: control target
= control target key end

     0   :  { %vm58_vm0 = vcmask 1043456   ;;  %v1878_v1 = vmov 0.0   ;;  %vm1879_vm1 = vmmov 0   ;;  %vm45_vm2 = vcmask 64512   ;;  %s1882_s15 = smov 32   ;;  %s2327_s1 = inlined_call_operand.vmem [shape: bf16[8,128], index: 1, kind: input, shape index: {}]   ;;  %s2328_s2 = inlined_call_operand.vmem [shape: bf16[32,128], index: 2, kind: input, shape index: {}]   ;;  %s2329_s0 = inlined_call_operand.vmem [shape: f32[8,8,8], index: 0, kind: input, shape index: {}]   ;;  %s2330_s4 = inlined_call_operand.vmem [shape: f32[2,128], index: 4, kind: input, shape index: {}]   ;;  %s2331_s3 = inlined_call_operand.vmem [shape: bf16[1,64,128], index: 3, kind: input, shape index: {}]   ;;  %s2332_s5 = inlined_call_operand.vmem [shape: bf16[32,4], index: 5, kind: input, shape index: {}]   ;;  %s2333_s6 = inlined_call_operand.vmem [shape: f32[1,4], index: 6, kind: input, shape index: {}]   ;;  %s2334_s7 = inlined_call_operand.vmem [shape: f32[8,4], index: 7, kind: output, shape index: {}]  }
   0x1   :  { %v40_v0 = vld [vmem:[%s2327_s1] sm:$0xf]  ;;  %1568 = vmatprep.subr.bf16.mxu1 %v1878_v1  ;;  %1572 = vmatprep.mubr.msk.bf16.mxu1 %vm1879_vm1, %v1878_v1  ;;  %v29_v5 = vld [vmem:[%s2329_s0 + $0x8] sm:$0xff]  ;;  %v30_v7 = vld [vmem:[%s2329_s0 + $0x10] sm:$0xff]  ;;  %v1880_v11 = vmov 0   ;;  %v41_v12 = vlaneseq  ;;  %vm151_vm3 = vcmask 261120  }
   0x2   :  { %1736 = vmatprep.subr.msk.bf16.mxu0 %vm58_vm0, %v40_v0  ;;  %v60_v2 = vsel %vm58_vm0, %v40_v0, 0  ;;  %v1932_v3 = vld [vmem:[%s2328_s2] sm:$0xff]   ;;  %v31_v8 = vld [vmem:[%s2329_s0 + $0x18] sm:$0xff]  ;;  %v1950_v10 = vld [vmem:[%s2328_s2 + $0x8] sm:$0xff]   ;;  %vm254_vm4 = vcmask 523264   ;;  %vm1435_vm5 = vcmask 31744  }
   0x3   :  { %v28_v4 = vld [vmem:[%s2329_s0] sm:$0xff]  ;;  %1559 = vmatpush3.bf16.msra.mxu0 %v60_v2  ;;  %1569 = vmatpush3.bf16.msra.mxu1 %v1932_v3  ;;  %v37_v9 = vpack.c.bf16 %v31_v8, %v30_v7  ;;  %v1964_v13 = vshrl.u32 %v41_v12, 7  ;;  %v33_v38 = vld [vmem:[%s2329_s0 + $0x28] sm:$0xff]  ;;  %v34_v39 = vld [vmem:[%s2329_s0 + $0x30] sm:$0xff] }
   0x4   :  { %v36_v6 = vpack.c.bf16 %v29_v5, %v28_v4  ;;  %1576 = vmatprep.subr.bf16.mxu0 %v1878_v1  ;;  %1570 = vmatprep.subr.bf16.mxu1 %v1878_v1  ;;  %v1970_v15 = vld [vmem:[%s2330_s4] sm:$0x3]  ;;  %s1881_s4 = smov 64   ;;  %v2004_v42 = vld [vmem:[%s2331_s3 + $0x8] sm:$0xff]   ;;  %v35_v43 = vld [vmem:[%s2329_s0 + $0x38] sm:$0xff] }
   0x5   :  { %v43_v14 = vsub.s32 0, %v1964_v13  ;;  %v32_v37 = vld [vmem:[%s2329_s0 + $0x20] sm:$0xff]  ;;  %v39_v44 = vpack.c.bf16 %v35_v43, %v34_v39  ;;  %v2017_v45 = vld [vmem:[%s2331_s3 + $0x10] sm:$0xff]   ;;  %v2028_v47 = vld [vmem:[%s2331_s3 + $0x18] sm:$0xff]   ;;  %v228_v59 = vsub.s32 1, %v1964_v13 }
   0x6   :  { %1560 = vmatprep.mubr.msk.bf16.mxu0 %vm45_vm2, %v36_v6  ;;  %v1999_v40 = vld [vmem:[%s2331_s3] sm:$0xff]   ;;  %v38_v41 = vpack.c.bf16 %v33_v38, %v32_v37 }
   0x7   :  { %1561 = vmatmul.mubr.msk.bf16.vlgmr.msra.gmra.mrb[0].mxu0 %vm45_vm2, %v37_v9  ;;  %1571 = vmatpush3.bf16.msra.mxu1 %v1950_v10  ;;  %v1973_v16 = vrot.slane %v1970_v15, %v43_v14  ;;  %v2063_v60 = vrot.slane %v1970_v15, %v228_v59 }
   0x8   :  { %1588 = vmatprep.subr.bf16.mxu1 %v1878_v1  ;;  %1577 = vmatpush3.bf16.msra.mxu0 %v1999_v40 }
   0x9   :  { %1564 = vmatprep.mubr.msk.bf16.mxu0 %vm45_vm2, %v38_v41  ;;  %1578 = vmatprep.subr.bf16.mxu0 %v1878_v1 }
   0xa   :  { %1573 = vmatmul.mubr.bf16.vlgmr.msra.gmra.mrb[0].mxu1 %v1880_v11 }
   0xb   :  { %1589 = vmatpush3.bf16.msra.mxu1 %v1932_v3  ;;  %1592 = vmatprep.mubr.msk.bf16.mxu1 %vm1879_vm1, %v1878_v1 }
   0xc   :  { %1590 = vmatprep.subr.bf16.mxu1 %v1878_v1  ;;  %1579 = vmatpush3.bf16.msra.mxu0 %v2004_v42 }
   0xd   :  { %1580 = vmatprep.subr.bf16.mxu0 %v1878_v1 }
   0xf   :  { %1591 = vmatpush3.bf16.msra.mxu1 %v1950_v10  ;;  %1565 = vmatmul.mubr.msk.bf16.gmra.mrb[4].mxu0 %vm45_vm2, %v39_v44 }
  0x10   :  { %1596 = vmatprep.subr.bf16.mxu1 %v1878_v1  ;;  %1584 = vmatprep.mubr.msk.bf16.mxu0 %vm1879_vm1, %v1878_v1 }
  0x11   :  { %1581 = vmatpush3.bf16.msra.mxu0 %v2017_v45 }
  0x12   :  { %1582 = vmatprep.subr.bf16.mxu0 %v1878_v1 }
  0x15   :  { %1583 = vmatpush3.bf16.msra.mxu0 %v2028_v47 }
  0x16   :  { %1608 = vmatprep.subr.bf16.mxu0 %v1878_v1 }
  0xda   :  { %v1975_v17 = vpop.f32.mrb[0].mxu0 }
  0xdb   :  { %v96_v18 = vpop.f32.mrb[1].mxu0 }
  0xdc   :  { %v97_v19 = vadd.f32 %v96_v18, %v1973_v16  ;;  %v1978_v20 = vpop.f32.mrb[2].mxu0 }
  0xdd   :  { %v1980_v21 = vpop.f32.mrb[3].mxu0  ;;  %v189_v22 = vpop.f32.mrb[0].mxu1 }
  0xde   :  { %v195_v23 = vadd.f32 %v189_v22, %v97_v19  ;;  %v1574_v24 = vpop.f32.mrb[1].mxu1  ;;  %v100_v61 = vadd.f32 %v1980_v21, %v1973_v16 }
  0xdf   :  { %v192_v25 = vpop.f32.mrb[2].mxu1 }
  0xe0   :  { %1750 = vtanh.f32 %v195_v23  ;;  %v1575_v26 = vpop.f32.mrb[3].mxu1  ;;  %v1447_v28 = vmul.f32 -1.442695, %v195_v23 }
  0xe2   :  { %1752 = vpow2.f32 %v1447_v28  ;;  %v2034_v51 = vpop.f32.mrb[4].mxu0 }
  0xe3   :  { %v2036_v52 = vpop.f32.mrb[5].mxu0 }
  0xe4   :  { %v2038_v53 = vpop.f32.mrb[6].mxu0 }
  0xe5   :  { %v2040_v54 = vpop.f32.mrb[7].mxu0 }
  0xea   :  { %v1751_v27 = vpop.eup %1750 }
  0xeb   :  { %205 = vrot.lane.b32.xlu0 %v1751_v27, %s1881_s4 }
  0xec   :  { %v1753_v29 = vpop.eup %1752 }
  0xed   :  { %v199_v30 = vadd.f32 1.0, %v1753_v29 }
  0xef   :  { %1754 = vrcp.f32 %v199_v30 }
  0xf9   :  { %v1755_v31 = vpop.eup %1754 }
  0xfa   :  { %v203_v34 = vmul.f32 0.0, %v1755_v31 }
 0x15d   :  { %v206_v32 = vpop.permute.xlu0 %205 }
 0x15e   :  { %v208_v33 = vmul.f32 %v1755_v31, %v206_v32 }
 0x160   :  { %210 = vrot.lane.b32.xlu0 %v208_v33, %s1882_s15 }
 0x1d2   :  { %v211_v35 = vpop.permute.xlu0 %210 }
 0x1d3   :  { %v1984_v36 = vadd.f32 %v211_v35, %v203_v34 }
 0x1d5   :  { %1756 = vtanh.f32 %v1984_v36 }
 0x1df   :  { %v1757_v46 = vpop.eup %1756 }
 0x1e0   :  { %216 = vrot.lane.b32.xlu1 %v1757_v46, %s1881_s4 }
 0x252   :  { %v217_v48 = vpop.permute.xlu1 %216 }
 0x253   :  { %v219_v49 = vmul.f32 %v1755_v31, %v217_v48 }
 0x255   :  { %v322_v50 = vpack.c.bf16 %v219_v49, %v219_v49  ;;  %221 = vrot.lane.b32.xlu1 %v219_v49, %s1882_s15 }
 0x257   :  { %324 = vrot.lane.b32.xlu0 %v322_v50, %s1882_s15  ;;  %v105_v50 = vadd.f32 %v1975_v17, %v1973_v16 }
 0x2c7   :  { %v222_v55 = vpop.permute.xlu1 %221 }
 0x2c8   :  { %v224_v56 = vsel %vm151_vm3, %v222_v55, 0.0 }
 0x2c9   :  { %v225_v57 = vpack.c.bf16 %v224_v56, %v224_v56  ;;  %v325_v58 = vpop.permute.xlu0 %324 }
 0x2ca   :  { %1593 = vmatmul.mubr.msk.bf16.vlgmr.msra.gmra.mrb[4].mxu1 %vm151_vm3, %v325_v58 }
 0x2cb   :  { %1585 = vmatmul.mubr.msk.bf16.vlgmr.msra.gmra.mrb[8].mxu0 %vm254_vm4, %v225_v57  ;;  %1597 = vmatpush3.bf16.msra.mxu1 %v1999_v40 }
 0x2cc   :  { %1598 = vmatprep.subr.bf16.mxu1 %v1878_v1  ;;  %1609 = vmatpush3.bf16.msra.mxu0 %v1932_v3 }
 0x2cd   :  { %1610 = vmatprep.subr.bf16.mxu0 %v1878_v1  ;;  %1604 = vmatprep.mubr.msk.bf16.mxu1 %vm1879_vm1, %v1878_v1 }
 0x2ce   :  { %1612 = vmatprep.mubr.msk.bf16.mxu0 %vm1879_vm1, %v1878_v1 }
 0x2cf   :  { %1599 = vmatpush3.bf16.msra.mxu1 %v2004_v42 }
 0x2d0   :  { %1600 = vmatprep.subr.bf16.mxu1 %v1878_v1  ;;  %1611 = vmatpush3.bf16.msra.mxu0 %v1950_v10 }
 0x2d1   :  { %1616 = vmatprep.subr.bf16.mxu0 %v1878_v1 }
 0x2d3   :  { %1601 = vmatpush3.bf16.msra.mxu1 %v2017_v45 }
 0x2d4   :  { %1602 = vmatprep.subr.bf16.mxu1 %v1878_v1 }
 0x2d7   :  { %1603 = vmatpush3.bf16.msra.mxu1 %v2028_v47 }
 0x2d8   :  { %1628 = vmatprep.subr.bf16.mxu1 %v1878_v1 }
 0x39d   :  { %v363_v62 = vpop.f32.mrb[4].mxu1 }
 0x39e   :  { %v369_v63 = vadd.f32 %v363_v62, %v100_v61  ;;  %v292_v0 = vpop.f32.mrb[8].mxu0  ;;  %v1594_v2 = vpop.f32.mrb[5].mxu1 }
 0x39f   :  { %v293_v4 = vadd.f32 %v292_v0, %v2063_v60  ;;  %v1586_v5 = vpop.f32.mrb[9].mxu0  ;;  %v366_v6 = vpop.f32.mrb[6].mxu1 }
 0x3a0   :  { %1758 = vtanh.f32 %v369_v63  ;;  %v295_v7 = vpop.f32.mrb[10].mxu0  ;;  %v1595_v8 = vpop.f32.mrb[7].mxu1  ;;  %v1455_v13 = vmul.f32 -1.442695, %v369_v63 }
 0x3a1   :  { %1760 = vtanh.f32 %v293_v4  ;;  %v1587_v9 = vpop.f32.mrb[11].mxu0  ;;  %v1453_v14 = vmul.f32 -1.442695, %v293_v4 }
 0x3a2   :  { %1762 = vpow2.f32 %v1455_v13 }
 0x3a3   :  { %1764 = vpow2.f32 %v1453_v14 }
 0x3aa   :  { %v1759_v11 = vpop.eup %1758 }
 0x3ab   :  { %v1761_v12 = vpop.eup %1760  ;;  %379 = vrot.lane.b32.xlu0 %v1759_v11, %s1881_s4 }
 0x3ac   :  { %307 = vrot.lane.b32.xlu1 %v1761_v12, %s1881_s4  ;;  %v1763_v15 = vpop.eup %1762 }
 0x3ad   :  { %v1765_v18 = vpop.eup %1764  ;;  %v373_v19 = vadd.f32 1.0, %v1763_v15 }
 0x3ae   :  { %v301_v21 = vadd.f32 1.0, %v1765_v18 }
 0x3af   :  { %1766 = vrcp.f32 %v373_v19 }
 0x3b0   :  { %1768 = vrcp.f32 %v301_v21 }
 0x3b9   :  { %v1767_v22 = vpop.eup %1766 }
 0x3ba   :  { %v1769_v24 = vpop.eup %1768  ;;  %v377_v28 = vmul.f32 %v1767_v22, %v1984_v36 }
 0x3bb   :  { %v305_v30 = vmul.f32 0.0, %v1769_v24 }
 0x41d   :  { %v380_v23 = vpop.permute.xlu0 %379 }
 0x41e   :  { %v382_v25 = vmul.f32 %v1767_v22, %v380_v23  ;;  %v308_v26 = vpop.permute.xlu1 %307 }
 0x41f   :  { %v310_v27 = vmul.f32 %v1769_v24, %v308_v26 }
 0x420   :  { %384 = vrot.lane.b32.xlu0 %v382_v25, %s1882_s15 }
 0x421   :  { %312 = vrot.lane.b32.xlu1 %v310_v27, %s1882_s15 }
 0x492   :  { %v385_v29 = vpop.permute.xlu0 %384 }
 0x493   :  { %v2073_v31 = vadd.f32 %v385_v29, %v377_v28  ;;  %v313_v32 = vpop.permute.xlu1 %312 }
 0x494   :  { %v2075_v33 = vadd.f32 %v313_v32, %v305_v30 }
 0x495   :  { %1770 = vtanh.f32 %v2073_v31 }
 0x496   :  { %1772 = vtanh.f32 %v2075_v33 }
 0x49f   :  { %v1771_v34 = vpop.eup %1770 }
 0x4a0   :  { %v1773_v35 = vpop.eup %1772  ;;  %390 = vrot.lane.b32.xlu0 %v1771_v34, %s1881_s4 }
 0x4a1   :  { %318 = vrot.lane.b32.xlu1 %v1773_v35, %s1881_s4 }
 0x512   :  { %v391_v37 = vpop.permute.xlu0 %390 }
 0x513   :  { %v393_v38 = vmul.f32 %v1767_v22, %v391_v37  ;;  %v319_v36 = vpop.permute.xlu1 %318 }
 0x514   :  { %v321_v39 = vmul.f32 %v1769_v24, %v319_v36 }
 0x515   :  { %395 = vrot.lane.b32.xlu1 %v393_v38, %s1882_s15  ;;  %v471_v41 = vpack.c.bf16 %v393_v38, %v393_v38 }
 0x516   :  { %399 = vrot.lane.b32.xlu0 %v321_v39, %s1881_s4  ;;  %v108_v39 = vadd.f32 %v1978_v20, %v1973_v16 }
 0x519   :  { %473 = vrot.lane.b32.xlu1 %v471_v41, %s1882_s15 }
 0x587   :  { %v396_v43 = vpop.permute.xlu1 %395 }
 0x588   :  { %v400_v44 = vpop.permute.xlu0 %399 }
 0x589   :  { %v402_v46 = vsel %vm151_vm3, %v396_v43, %v400_v44 }
 0x58a   :  { %v403_v48 = vpack.c.bf16 %v402_v46, %v402_v46 }
 0x58b   :  { %v474_v49 = vpop.permute.xlu1 %473 }
 0x58c   :  { %1605 = vmatmul.mubr.msk.bf16.vlgmr.msra.gmra.mrb[8].mxu1 %vm254_vm4, %v403_v48  ;;  %1613 = vmatmul.mubr.msk.bf16.vlgmr.msra.gmra.mrb[12].mxu0 %vm151_vm3, %v474_v49 }
 0x58d   :  { %1617 = vmatpush3.bf16.msra.mxu0 %v1999_v40  ;;  %1629 = vmatpush3.bf16.msra.mxu1 %v1932_v3 }
 0x58e   :  { %1618 = vmatprep.subr.bf16.mxu0 %v1878_v1  ;;  %1630 = vmatprep.subr.bf16.mxu1 %v1878_v1 }
 0x58f   :  { %1624 = vmatprep.mubr.msk.bf16.mxu0 %vm1879_vm1, %v1878_v1  ;;  %1632 = vmatprep.mubr.msk.bf16.mxu1 %vm1879_vm1, %v1878_v1 }
 0x591   :  { %1619 = vmatpush3.bf16.msra.mxu0 %v2004_v42  ;;  %1631 = vmatpush3.bf16.msra.mxu1 %v1950_v10 }
 0x592   :  { %1620 = vmatprep.subr.bf16.mxu0 %v1878_v1  ;;  %1636 = vmatprep.subr.bf16.mxu1 %v1878_v1 }
 0x595   :  { %1621 = vmatpush3.bf16.msra.mxu0 %v2017_v45 }
 0x596   :  { %1622 = vmatprep.subr.bf16.mxu0 %v1878_v1 }
 0x599   :  { %1623 = vmatpush3.bf16.msra.mxu0 %v2028_v47 }
 0x59a   :  { %1648 = vmatprep.subr.bf16.mxu0 %v1878_v1 }
 0x65f   :  { %v441_v55 = vpop.f32.mrb[8].mxu1  ;;  %v512_v56 = vpop.f32.mrb[12].mxu0 }
 0x660   :  { %v442_v57 = vadd.f32 %v441_v55, %v2063_v60  ;;  %v518_v58 = vadd.f32 %v512_v56, %v105_v50  ;;  %v1606_v59 = vpop.f32.mrb[9].mxu1  ;;  %v1614_v61 = vpop.f32.mrb[13].mxu0 }
 0x661   :  { %v444_v62 = vpop.f32.mrb[10].mxu1  ;;  %v515_v63 = vpop.f32.mrb[14].mxu0 }
 0x662   :  { %1774 = vtanh.f32 %v442_v57  ;;  %v1607_v0 = vpop.f32.mrb[11].mxu1  ;;  %v1615_v2 = vpop.f32.mrb[15].mxu0  ;;  %v1457_v17 = vmul.f32 -1.442695, %v442_v57  ;;  %v1459_v6 = vmul.f32 -1.442695, %v518_v58 }
 0x663   :  { %1776 = vtanh.f32 %v518_v58 }
 0x664   :  { %1778 = vpow2.f32 %v1457_v17 }
 0x665   :  { %1780 = vpow2.f32 %v1459_v6 }
 0x66c   :  { %v1775_v4 = vpop.eup %1774 }
 0x66d   :  { %v1777_v5 = vpop.eup %1776  ;;  %456 = vrot.lane.b32.xlu0 %v1775_v4, %s1881_s4 }
 0x66e   :  { %528 = vrot.lane.b32.xlu1 %v1777_v5, %s1881_s4  ;;  %v1779_v7 = vpop.eup %1778 }
 0x66f   :  { %v1781_v8 = vpop.eup %1780  ;;  %v450_v9 = vadd.f32 1.0, %v1779_v7 }
 0x670   :  { %v522_v11 = vadd.f32 1.0, %v1781_v8 }
 0x671   :  { %1782 = vrcp.f32 %v450_v9 }
 0x672   :  { %1784 = vrcp.f32 %v522_v11 }
 0x67b   :  { %v1783_v12 = vpop.eup %1782 }
 0x67c   :  { %v1785_v14 = vpop.eup %1784  ;;  %v454_v21 = vmul.f32 %v1783_v12, %v2075_v33 }
 0x67d   :  { %v526_v22 = vmul.f32 %v1785_v14, %v2073_v31 }
 0x6df   :  { %v457_v13 = vpop.permute.xlu0 %456 }
 0x6e0   :  { %v529_v15 = vpop.permute.xlu1 %528  ;;  %v459_v18 = vmul.f32 %v1783_v12, %v457_v13 }
 0x6e1   :  { %v531_v19 = vmul.f32 %v1785_v14, %v529_v15 }
 0x6e2   :  { %461 = vrot.lane.b32.xlu0 %v459_v18, %s1882_s15 }
 0x6e3   :  { %533 = vrot.lane.b32.xlu1 %v531_v19, %s1882_s15 }
 0x754   :  { %v462_v23 = vpop.permute.xlu0 %461 }
 0x755   :  { %v534_v24 = vpop.permute.xlu1 %533  ;;  %v2112_v25 = vadd.f32 %v462_v23, %v454_v21 }
 0x756   :  { %v2114_v26 = vadd.f32 %v534_v24, %v526_v22 }
 0x757   :  { %1786 = vtanh.f32 %v2112_v25 }
 0x758   :  { %1788 = vtanh.f32 %v2114_v26 }
 0x761   :  { %v1787_v27 = vpop.eup %1786 }
 0x762   :  { %v1789_v28 = vpop.eup %1788  ;;  %467 = vrot.lane.b32.xlu0 %v1787_v27, %s1881_s4 }
 0x763   :  { %539 = vrot.lane.b32.xlu1 %v1789_v28, %s1881_s4 }
 0x7d4   :  { %v468_v29 = vpop.permute.xlu0 %467 }
 0x7d5   :  { %v540_v30 = vpop.permute.xlu1 %539  ;;  %v470_v32 = vmul.f32 %v1783_v12, %v468_v29 }
 0x7d6   :  { %v542_v31 = vmul.f32 %v1785_v14, %v540_v30 }
 0x7d7   :  { %548 = vrot.lane.b32.xlu1 %v470_v32, %s1881_s4  ;;  %v113_v32 = vadd.f32 %v2036_v52, %v1973_v16 }
 0x7d8   :  { %544 = vrot.lane.b32.xlu0 %v542_v31, %s1882_s15  ;;  %v620_v33 = vpack.c.bf16 %v542_v31, %v542_v31 }
 0x7dc   :  { %622 = vrot.lane.b32.xlu0 %v620_v33, %s1882_s15 }
 0x849   :  { %v549_v34 = vpop.permute.xlu1 %548 }
 0x84a   :  { %v545_v35 = vpop.permute.xlu0 %544 }
 0x84b   :  { %v551_v37 = vsel %vm151_vm3, %v545_v35, %v549_v34 }
 0x84c   :  { %v552_v38 = vpack.c.bf16 %v551_v37, %v551_v37 }
 0x84e   :  { %1625 = vmatmul.mubr.msk.bf16.vlgmr.msra.gmra.mrb[16].mxu0 %vm254_vm4, %v552_v38  ;;  %v623_v36 = vpop.permute.xlu0 %622 }
 0x84f   :  { %1633 = vmatmul.mubr.msk.bf16.vlgmr.msra.gmra.mrb[12].mxu1 %vm151_vm3, %v623_v36  ;;  %1649 = vmatpush3.bf16.msra.mxu0 %v1932_v3 }
 0x850   :  { %1637 = vmatpush3.bf16.msra.mxu1 %v1999_v40  ;;  %1650 = vmatprep.subr.bf16.mxu0 %v1878_v1 }
 0x851   :  { %1638 = vmatprep.subr.bf16.mxu1 %v1878_v1  ;;  %1644 = vmatprep.mubr.msk.bf16.mxu1 %vm1879_vm1, %v1878_v1 }
 0x852   :  { %1652 = vmatprep.mubr.msk.bf16.mxu0 %vm1879_vm1, %v1878_v1 }
 0x853   :  { %1651 = vmatpush3.bf16.msra.mxu0 %v1950_v10 }
 0x854   :  { %1639 = vmatpush3.bf16.msra.mxu1 %v2004_v42  ;;  %1656 = vmatprep.subr.bf16.mxu0 %v1878_v1 }
 0x855   :  { %1640 = vmatprep.subr.bf16.mxu1 %v1878_v1 }
 0x858   :  { %1641 = vmatpush3.bf16.msra.mxu1 %v2017_v45 }
 0x859   :  { %1642 = vmatprep.subr.bf16.mxu1 %v1878_v1 }
 0x85c   :  { %1643 = vmatpush3.bf16.msra.mxu1 %v2028_v47 }
 0x85d   :  { %1668 = vmatprep.subr.bf16.mxu1 %v1878_v1 }
 0x921   :  { %v590_v41 = vpop.f32.mrb[16].mxu0 }
 0x922   :  { %v591_v43 = vadd.f32 %v590_v41, %v2063_v60  ;;  %v1626_v44 = vpop.f32.mrb[17].mxu0  ;;  %v661_v46 = vpop.f32.mrb[12].mxu1 }
 0x923   :  { %v667_v48 = vadd.f32 %v661_v46, %v108_v39  ;;  %v593_v49 = vpop.f32.mrb[18].mxu0  ;;  %v1634_v50 = vpop.f32.mrb[13].mxu1 }
 0x924   :  { %1790 = vtanh.f32 %v591_v43  ;;  %v1627_v55 = vpop.f32.mrb[19].mxu0  ;;  %v664_v56 = vpop.f32.mrb[14].mxu1  ;;  %v1461_v20 = vmul.f32 -1.442695, %v591_v43 }
 0x925   :  { %1792 = vtanh.f32 %v667_v48  ;;  %v1635_v57 = vpop.f32.mrb[15].mxu1  ;;  %v1463_v61 = vmul.f32 -1.442695, %v667_v48 }
 0x926   :  { %1794 = vpow2.f32 %v1461_v20 }
 0x927   :  { %1796 = vpow2.f32 %v1463_v61 }
 0x92e   :  { %v1791_v58 = vpop.eup %1790 }
 0x92f   :  { %v1793_v59 = vpop.eup %1792  ;;  %605 = vrot.lane.b32.xlu1 %v1791_v58, %s1881_s4 }
 0x930   :  { %677 = vrot.lane.b32.xlu0 %v1793_v59, %s1881_s4  ;;  %v1795_v62 = vpop.eup %1794 }
 0x931   :  { %v1797_v63 = vpop.eup %1796  ;;  %v599_v0 = vadd.f32 1.0, %v1795_v62 }
 0x932   :  { %v671_v2 = vadd.f32 1.0, %v1797_v63 }
 0x933   :  { %1798 = vrcp.f32 %v599_v0 }
 0x934   :  { %1800 = vrcp.f32 %v671_v2 }
 0x93d   :  { %v1799_v4 = vpop.eup %1798 }
 0x93e   :  { %v1801_v17 = vpop.eup %1800  ;;  %v603_v9 = vmul.f32 %v1799_v4, %v2112_v25 }
 0x93f   :  { %v675_v12 = vmul.f32 %v1801_v17, %v2114_v26 }
 0x9a1   :  { %v606_v5 = vpop.permute.xlu1 %605 }
 0x9a2   :  { %v608_v6 = vmul.f32 %v1799_v4, %v606_v5  ;;  %v678_v7 = vpop.permute.xlu0 %677 }
 0x9a3   :  { %v680_v8 = vmul.f32 %v1801_v17, %v678_v7 }
 0x9a4   :  { %610 = vrot.lane.b32.xlu1 %v608_v6, %s1882_s15 }
 0x9a5   :  { %682 = vrot.lane.b32.xlu0 %v680_v8, %s1882_s15 }
 0xa16   :  { %v611_v11 = vpop.permute.xlu1 %610 }
 0xa17   :  { %v2151_v13 = vadd.f32 %v611_v11, %v603_v9  ;;  %v683_v14 = vpop.permute.xlu0 %682 }
 0xa18   :  { %v2153_v15 = vadd.f32 %v683_v14, %v675_v12 }
 0xa19   :  { %1802 = vtanh.f32 %v2151_v13 }
 0xa1a   :  { %1804 = vtanh.f32 %v2153_v15 }
 0xa23   :  { %v1803_v18 = vpop.eup %1802 }
 0xa24   :  { %v1805_v19 = vpop.eup %1804  ;;  %616 = vrot.lane.b32.xlu1 %v1803_v18, %s1881_s4 }
 0xa25   :  { %688 = vrot.lane.b32.xlu0 %v1805_v19, %s1881_s4 }
 0xa96   :  { %v617_v21 = vpop.permute.xlu1 %616 }
 0xa97   :  { %v619_v22 = vmul.f32 %v1799_v4, %v617_v21  ;;  %v689_v23 = vpop.permute.xlu0 %688 }
 0xa98   :  { %v691_v24 = vmul.f32 %v1801_v17, %v689_v23 }
 0xa99   :  { %697 = vrot.lane.b32.xlu0 %v619_v22, %s1881_s4  ;;  %v116_v22 = vadd.f32 %v2040_v54, %v1973_v16 }
 0xa9a   :  { %693 = vrot.lane.b32.xlu1 %v691_v24, %s1882_s15  ;;  %v769_v25 = vpack.c.bf16 %v691_v24, %v691_v24 }
 0xa9e   :  { %771 = vrot.lane.b32.xlu1 %v769_v25, %s1882_s15 }
 0xb0b   :  { %v698_v26 = vpop.permute.xlu0 %697 }
 0xb0c   :  { %v694_v27 = vpop.permute.xlu1 %693 }
 0xb0d   :  { %v700_v28 = vsel %vm151_vm3, %v694_v27, %v698_v26 }
 0xb0e   :  { %v701_v29 = vpack.c.bf16 %v700_v28, %v700_v28 }
 0xb10   :  { %v772_v30 = vpop.permute.xlu1 %771  ;;  %1645 = vmatmul.mubr.msk.bf16.vlgmr.msra.gmra.mrb[16].mxu1 %vm254_vm4, %v701_v29 }
 0xb11   :  { %1653 = vmatmul.mubr.msk.bf16.vlgmr.msra.gmra.mrb[20].mxu0 %vm151_vm3, %v772_v30  ;;  %1669 = vmatpush3.bf16.msra.mxu1 %v1932_v3 }
 0xb12   :  { %1657 = vmatpush3.bf16.msra.mxu0 %v1999_v40  ;;  %1670 = vmatprep.subr.bf16.mxu1 %v1878_v1 }
 0xb13   :  { %1658 = vmatprep.subr.bf16.mxu0 %v1878_v1  ;;  %1664 = vmatprep.mubr.msk.bf16.mxu0 %vm1879_vm1, %v1878_v1 }
 0xb14   :  { %1672 = vmatprep.mubr.msk.bf16.mxu1 %vm1879_vm1, %v1878_v1 }
 0xb15   :  { %1671 = vmatpush3.bf16.msra.mxu1 %v1950_v10 }
 0xb16   :  { %1659 = vmatpush3.bf16.msra.mxu0 %v2004_v42  ;;  %1676 = vmatprep.subr.bf16.mxu1 %v1878_v1 }
 0xb17   :  { %1660 = vmatprep.subr.bf16.mxu0 %v1878_v1 }
 0xb1a   :  { %1661 = vmatpush3.bf16.msra.mxu0 %v2017_v45 }
 0xb1b   :  { %1662 = vmatprep.subr.bf16.mxu0 %v1878_v1 }
 0xb1e   :  { %1663 = vmatpush3.bf16.msra.mxu0 %v2028_v47 }
 0xb1f   :  { %1688 = vmatprep.subr.bf16.mxu0 %v1878_v1 }
 0xbe3   :  { %v739_v31 = vpop.f32.mrb[16].mxu1 }
 0xbe4   :  { %v740_v33 = vadd.f32 %v739_v31, %v2063_v60  ;;  %v1646_v34 = vpop.f32.mrb[17].mxu1  ;;  %v810_v35 = vpop.f32.mrb[20].mxu0 }
 0xbe5   :  { %v816_v37 = vadd.f32 %v810_v35, %v113_v32  ;;  %v742_v38 = vpop.f32.mrb[18].mxu1  ;;  %v1654_v36 = vpop.f32.mrb[21].mxu0 }
 0xbe6   :  { %1806 = vtanh.f32 %v740_v33  ;;  %v1647_v39 = vpop.f32.mrb[19].mxu1  ;;  %v813_v41 = vpop.f32.mrb[22].mxu0  ;;  %v1465_v52 = vmul.f32 -1.442695, %v740_v33 }
 0xbe7   :  { %1808 = vtanh.f32 %v816_v37  ;;  %v1655_v43 = vpop.f32.mrb[23].mxu0  ;;  %v1467_v48 = vmul.f32 -1.442695, %v816_v37 }
 0xbe8   :  { %1810 = vpow2.f32 %v1465_v52 }
 0xbe9   :  { %1812 = vpow2.f32 %v1467_v48 }
 0xbf0   :  { %v1807_v44 = vpop.eup %1806 }
 0xbf1   :  { %v1809_v46 = vpop.eup %1808  ;;  %754 = vrot.lane.b32.xlu0 %v1807_v44, %s1881_s4 }
 0xbf2   :  { %826 = vrot.lane.b32.xlu1 %v1809_v46, %s1881_s4  ;;  %v1811_v49 = vpop.eup %1810 }
 0xbf3   :  { %v1813_v50 = vpop.eup %1812  ;;  %v748_v55 = vadd.f32 1.0, %v1811_v49 }
 0xbf4   :  { %v820_v56 = vadd.f32 1.0, %v1813_v50 }
 0xbf5   :  { %1814 = vrcp.f32 %v748_v55 }
 0xbf6   :  { %1816 = vrcp.f32 %v820_v56 }
 0xbff   :  { %v1815_v57 = vpop.eup %1814 }
 0xc00   :  { %v1817_v59 = vpop.eup %1816  ;;  %v752_v63 = vmul.f32 %v1815_v57, %v2151_v13 }
 0xc01   :  { %v824_v2 = vmul.f32 %v1817_v59, %v2153_v15 }
 0xc63   :  { %v755_v58 = vpop.permute.xlu0 %754 }
 0xc64   :  { %v757_v20 = vmul.f32 %v1815_v57, %v755_v58  ;;  %v827_v61 = vpop.permute.xlu1 %826 }
 0xc65   :  { %v829_v62 = vmul.f32 %v1817_v59, %v827_v61 }
 0xc66   :  { %759 = vrot.lane.b32.xlu0 %v757_v20, %s1882_s15 }
 0xc67   :  { %831 = vrot.lane.b32.xlu1 %v829_v62, %s1882_s15 }
 0xcd8   :  { %v760_v0 = vpop.permute.xlu0 %759 }
 0xcd9   :  { %v2190_v4 = vadd.f32 %v760_v0, %v752_v63  ;;  %v832_v5 = vpop.permute.xlu1 %831 }
 0xcda   :  { %v2192_v17 = vadd.f32 %v832_v5, %v824_v2 }
 0xcdb   :  { %1818 = vtanh.f32 %v2190_v4 }
 0xcdc   :  { %1820 = vtanh.f32 %v2192_v17 }
 0xce5   :  { %v1819_v6 = vpop.eup %1818 }
 0xce6   :  { %v1821_v7 = vpop.eup %1820  ;;  %765 = vrot.lane.b32.xlu0 %v1819_v6, %s1881_s4 }
 0xce7   :  { %837 = vrot.lane.b32.xlu1 %v1821_v7, %s1881_s4 }
 0xd58   :  { %v766_v8 = vpop.permute.xlu0 %765 }
 0xd59   :  { %v768_v9 = vmul.f32 %v1815_v57, %v766_v8  ;;  %v838_v11 = vpop.permute.xlu1 %837 }
 0xd5a   :  { %v840_v12 = vmul.f32 %v1817_v59, %v838_v11 }
 0xd5b   :  { %846 = vrot.lane.b32.xlu1 %v768_v9, %s1881_s4 }
 0xd5c   :  { %842 = vrot.lane.b32.xlu0 %v840_v12, %s1882_s15  ;;  %v918_v13 = vpack.c.bf16 %v840_v12, %v840_v12 }
 0xd60   :  { %920 = vrot.lane.b32.xlu0 %v918_v13, %s1882_s15 }
 0xdcd   :  { %v847_v14 = vpop.permute.xlu1 %846 }
 0xdce   :  { %v843_v15 = vpop.permute.xlu0 %842 }
 0xdcf   :  { %v849_v18 = vsel %vm151_vm3, %v843_v15, %v847_v14 }
 0xdd0   :  { %v850_v19 = vpack.c.bf16 %v849_v18, %v849_v18 }
 0xdd2   :  { %1665 = vmatmul.mubr.msk.bf16.vlgmr.msra.gmra.mrb[24].mxu0 %vm254_vm4, %v850_v19  ;;  %v921_v21 = vpop.permute.xlu0 %920 }
 0xdd3   :  { %1673 = vmatmul.mubr.msk.bf16.vlgmr.msra.gmra.mrb[20].mxu1 %vm151_vm3, %v921_v21  ;;  %1689 = vmatpush3.bf16.msra.mxu0 %v1932_v3 }
 0xdd4   :  { %1677 = vmatpush3.bf16.msra.mxu1 %v1999_v40  ;;  %1690 = vmatprep.subr.bf16.mxu0 %v1878_v1 }
 0xdd5   :  { %1678 = vmatprep.subr.bf16.mxu1 %v1878_v1  ;;  %1684 = vmatprep.mubr.msk.bf16.mxu1 %vm1879_vm1, %v1878_v1 }
 0xdd6   :  { %1692 = vmatprep.mubr.msk.bf16.mxu0 %vm1879_vm1, %v1878_v1 }
 0xdd7   :  { %1691 = vmatpush3.bf16.msra.mxu0 %v1950_v10 }
 0xdd8   :  { %1679 = vmatpush3.bf16.msra.mxu1 %v2004_v42  ;;  %1696 = vmatprep.subr.bf16.mxu0 %v1878_v1 }
 0xdd9   :  { %1680 = vmatprep.subr.bf16.mxu1 %v1878_v1 }
 0xddc   :  { %1681 = vmatpush3.bf16.msra.mxu1 %v2017_v45 }
 0xddd   :  { %1682 = vmatprep.subr.bf16.mxu1 %v1878_v1 }
 0xde0   :  { %1683 = vmatpush3.bf16.msra.mxu1 %v2028_v47 }
 0xde1   :  { %1708 = vmatprep.subr.bf16.mxu1 %v1878_v1 }
 0xea5   :  { %v888_v23 = vpop.f32.mrb[24].mxu0 }
 0xea6   :  { %v889_v24 = vadd.f32 %v888_v23, %v2063_v60  ;;  %v1666_v25 = vpop.f32.mrb[25].mxu0  ;;  %v959_v26 = vpop.f32.mrb[20].mxu1 }
 0xea7   :  { %v965_v27 = vadd.f32 %v959_v26, %v116_v22  ;;  %v891_v28 = vpop.f32.mrb[26].mxu0  ;;  %v1674_v29 = vpop.f32.mrb[21].mxu1 }
 0xea8   :  { %1822 = vtanh.f32 %v889_v24  ;;  %v1667_v30 = vpop.f32.mrb[27].mxu0  ;;  %v962_v32 = vpop.f32.mrb[22].mxu1  ;;  %v1469_v54 = vmul.f32 -1.442695, %v889_v24 }
 0xea9   :  { %1824 = vtanh.f32 %v965_v27  ;;  %v1675_v31 = vpop.f32.mrb[23].mxu1  ;;  %v1471_v35 = vmul.f32 -1.442695, %v965_v27 }
 0xeaa   :  { %1826 = vpow2.f32 %v1469_v54 }
 0xeab   :  { %1828 = vpow2.f32 %v1471_v35 }
 0xeb2   :  { %v1823_v33 = vpop.eup %1822 }
 0xeb3   :  { %v1825_v34 = vpop.eup %1824  ;;  %903 = vrot.lane.b32.xlu1 %v1823_v33, %s1881_s4 }
 0xeb4   :  { %975 = vrot.lane.b32.xlu0 %v1825_v34, %s1881_s4  ;;  %v1827_v37 = vpop.eup %1826 }
 0xeb5   :  { %v1829_v38 = vpop.eup %1828  ;;  %v897_v36 = vadd.f32 1.0, %v1827_v37 }
 0xeb6   :  { %v969_v39 = vadd.f32 1.0, %v1829_v38 }
 0xeb7   :  { %1830 = vrcp.f32 %v897_v36 }
 0xeb8   :  { %1832 = vrcp.f32 %v969_v39 }
 0xec1   :  { %v1831_v41 = vpop.eup %1830 }
 0xec2   :  { %v1833_v44 = vpop.eup %1832  ;;  %v901_v49 = vmul.f32 %v1831_v41, %v2190_v4 }
 0xec3   :  { %v973_v55 = vmul.f32 %v1833_v44, %v2192_v17 }
 0xf25   :  { %v904_v43 = vpop.permute.xlu1 %903 }
 0xf26   :  { %v906_v46 = vmul.f32 %v1831_v41, %v904_v43  ;;  %v976_v52 = vpop.permute.xlu0 %975 }
 0xf27   :  { %v978_v48 = vmul.f32 %v1833_v44, %v976_v52 }
 0xf28   :  { %908 = vrot.lane.b32.xlu1 %v906_v46, %s1882_s15 }
 0xf29   :  { %980 = vrot.lane.b32.xlu0 %v978_v48, %s1882_s15 }
 0xf9a   :  { %v909_v50 = vpop.permute.xlu1 %908 }
 0xf9b   :  { %v2229_v56 = vadd.f32 %v909_v50, %v901_v49  ;;  %v981_v57 = vpop.permute.xlu0 %980 }
 0xf9c   :  { %v2231_v58 = vadd.f32 %v981_v57, %v973_v55 }
 0xf9d   :  { %1834 = vtanh.f32 %v2229_v56 }
 0xf9e   :  { %1836 = vtanh.f32 %v2231_v58 }
 0xfa7   :  { %v1835_v59 = vpop.eup %1834 }
 0xfa8   :  { %v1837_v20 = vpop.eup %1836  ;;  %914 = vrot.lane.b32.xlu1 %v1835_v59, %s1881_s4 }
 0xfa9   :  { %986 = vrot.lane.b32.xlu0 %v1837_v20, %s1881_s4 }
0x101a   :  { %v915_v61 = vpop.permute.xlu1 %914 }
0x101b   :  { %v917_v62 = vmul.f32 %v1831_v41, %v915_v61  ;;  %v987_v63 = vpop.permute.xlu0 %986 }
0x101c   :  { %v989_v0 = vmul.f32 %v1833_v44, %v987_v63 }
0x101d   :  { %995 = vrot.lane.b32.xlu0 %v917_v62, %s1881_s4 }
0x101e   :  { %991 = vrot.lane.b32.xlu1 %v989_v0, %s1882_s15  ;;  %v1067_v2 = vpack.c.bf16 %v989_v0, %v989_v0 }
0x1022   :  { %1069 = vrot.lane.b32.xlu1 %v1067_v2, %s1882_s15 }
0x108f   :  { %v996_v4 = vpop.permute.xlu0 %995 }
0x1090   :  { %v992_v5 = vpop.permute.xlu1 %991 }
0x1091   :  { %v998_v17 = vsel %vm151_vm3, %v992_v5, %v996_v4 }
0x1092   :  { %v999_v6 = vpack.c.bf16 %v998_v17, %v998_v17 }
0x1094   :  { %v1070_v7 = vpop.permute.xlu1 %1069  ;;  %1685 = vmatmul.mubr.msk.bf16.vlgmr.msra.gmra.mrb[24].mxu1 %vm254_vm4, %v999_v6 }
0x1095   :  { %1693 = vmatmul.mubr.msk.bf16.vlgmr.msra.gmra.mrb[28].mxu0 %vm151_vm3, %v1070_v7  ;;  %1709 = vmatpush3.bf16.msra.mxu1 %v1932_v3  ;;  %v121_v3 = vadd.f32 %v2034_v51, %v1973_v16 }
0x1096   :  { %1697 = vmatpush3.bf16.msra.mxu0 %v1999_v40  ;;  %1710 = vmatprep.subr.bf16.mxu1 %v1878_v1 }
0x1097   :  { %1698 = vmatprep.subr.bf16.mxu0 %v1878_v1  ;;  %1704 = vmatprep.mubr.msk.bf16.mxu0 %vm1879_vm1, %v1878_v1 }
0x1098   :  { %1712 = vmatprep.mubr.msk.bf16.mxu1 %vm1879_vm1, %v1878_v1 }
0x1099   :  { %1711 = vmatpush3.bf16.msra.mxu1 %v1950_v10 }
0x109a   :  { %1699 = vmatpush3.bf16.msra.mxu0 %v2004_v42  ;;  %1716 = vmatprep.subr.bf16.mxu1 %v1878_v1 }
0x109b   :  { %1700 = vmatprep.subr.bf16.mxu0 %v1878_v1 }
0x109e   :  { %1701 = vmatpush3.bf16.msra.mxu0 %v2017_v45 }
0x109f   :  { %1702 = vmatprep.subr.bf16.mxu0 %v1878_v1 }
0x10a2   :  { %1703 = vmatpush3.bf16.msra.mxu0 %v2028_v47 }
0x10a3   :  { %1728 = vmatprep.subr.bf16.mxu0 %v1878_v1 }
0x1167   :  { %v1037_v8 = vpop.f32.mrb[24].mxu1 }
0x1168   :  { %v1038_v10 = vadd.f32 %v1037_v8, %v2063_v60  ;;  %v1686_v9 = vpop.f32.mrb[25].mxu1  ;;  %v1108_v11 = vpop.f32.mrb[28].mxu0 }
0x1169   :  { %v1114_v12 = vadd.f32 %v1108_v11, %v121_v3  ;;  %v1040_v13 = vpop.f32.mrb[26].mxu1  ;;  %v1694_v14 = vpop.f32.mrb[29].mxu0 }
0x116a   :  { %1838 = vtanh.f32 %v1038_v10  ;;  %v1687_v15 = vpop.f32.mrb[27].mxu1  ;;  %v1111_v18 = vpop.f32.mrb[30].mxu0  ;;  %v1473_v51 = vmul.f32 -1.442695, %v1038_v10 }
0x116b   :  { %1840 = vtanh.f32 %v1114_v12  ;;  %v1695_v19 = vpop.f32.mrb[31].mxu0  ;;  %v1475_v23 = vmul.f32 -1.442695, %v1114_v12 }
0x116c   :  { %1842 = vpow2.f32 %v1473_v51 }
0x116d   :  { %1844 = vpow2.f32 %v1475_v23 }
0x1174   :  { %v1839_v21 = vpop.eup %1838 }
0x1175   :  { %v1841_v22 = vpop.eup %1840  ;;  %1052 = vrot.lane.b32.xlu0 %v1839_v21, %s1881_s4 }
0x1176   :  { %1124 = vrot.lane.b32.xlu1 %v1841_v22, %s1881_s4  ;;  %v1843_v24 = vpop.eup %1842 }
0x1177   :  { %v1845_v25 = vpop.eup %1844  ;;  %v1046_v26 = vadd.f32 1.0, %v1843_v24 }
0x1178   :  { %v1118_v27 = vadd.f32 1.0, %v1845_v25 }
0x1179   :  { %1846 = vrcp.f32 %v1046_v26 }
0x117a   :  { %1848 = vrcp.f32 %v1118_v27 }
0x1183   :  { %v1847_v28 = vpop.eup %1846 }
0x1184   :  { %v1849_v30 = vpop.eup %1848  ;;  %v1050_v34 = vmul.f32 %v1847_v28, %v2229_v56 }
0x1185   :  { %v1122_v35 = vmul.f32 %v1849_v30, %v2231_v58  ;;  %v124_v58 = vadd.f32 %v2038_v53, %v1973_v16 }
0x11e7   :  { %v1053_v29 = vpop.permute.xlu0 %1052 }
0x11e8   :  { %v1055_v32 = vmul.f32 %v1847_v28, %v1053_v29  ;;  %v1125_v31 = vpop.permute.xlu1 %1124 }
0x11e9   :  { %v1127_v33 = vmul.f32 %v1849_v30, %v1125_v31 }
0x11ea   :  { %1057 = vrot.lane.b32.xlu0 %v1055_v32, %s1882_s15 }
0x11eb   :  { %1129 = vrot.lane.b32.xlu1 %v1127_v33, %s1882_s15 }
0x125c   :  { %v1058_v54 = vpop.permute.xlu0 %1057 }
0x125d   :  { %v2268_v37 = vadd.f32 %v1058_v54, %v1050_v34  ;;  %v1130_v38 = vpop.permute.xlu1 %1129 }
0x125e   :  { %v2270_v36 = vadd.f32 %v1130_v38, %v1122_v35 }
0x125f   :  { %1850 = vtanh.f32 %v2268_v37 }
0x1260   :  { %1852 = vtanh.f32 %v2270_v36 }
0x1269   :  { %v1851_v39 = vpop.eup %1850 }
0x126a   :  { %v1853_v41 = vpop.eup %1852  ;;  %1063 = vrot.lane.b32.xlu0 %v1851_v39, %s1881_s4 }
0x126b   :  { %1135 = vrot.lane.b32.xlu1 %v1853_v41, %s1881_s4 }
0x12dc   :  { %v1064_v43 = vpop.permute.xlu0 %1063 }
0x12dd   :  { %v1066_v44 = vmul.f32 %v1847_v28, %v1064_v43  ;;  %v1136_v46 = vpop.permute.xlu1 %1135 }
0x12de   :  { %v1138_v52 = vmul.f32 %v1849_v30, %v1136_v46 }
0x12df   :  { %1144 = vrot.lane.b32.xlu1 %v1066_v44, %s1881_s4 }
0x12e0   :  { %1140 = vrot.lane.b32.xlu0 %v1138_v52, %s1882_s15  ;;  %v1216_v48 = vpack.c.bf16 %v1138_v52, %v1138_v52  ;;  %v1748_v52 = vld [vmem:[%s2332_s5] sm:$0xff]  }
0x12e4   :  { %1218 = vrot.lane.b32.xlu0 %v1216_v48, %s1882_s15  ;;  %v1749_v48 = vld [vmem:[%s2332_s5 + $0x8] sm:$0xff]  }
0x1351   :  { %v1145_v49 = vpop.permute.xlu1 %1144 }
0x1352   :  { %v1141_v50 = vpop.permute.xlu0 %1140 }
0x1353   :  { %v1147_v55 = vsel %vm151_vm3, %v1141_v50, %v1145_v49 }
0x1354   :  { %v1148_v56 = vpack.c.bf16 %v1147_v55, %v1147_v55 }
0x1356   :  { %1705 = vmatmul.mubr.msk.bf16.vlgmr.msra.gmra.mrb[32].mxu0 %vm254_vm4, %v1148_v56  ;;  %v1219_v57 = vpop.permute.xlu0 %1218 }
0x1357   :  { %1713 = vmatmul.mubr.msk.bf16.vlgmr.msra.gmra.mrb[28].mxu1 %vm151_vm3, %v1219_v57  ;;  %1732 = vmatprep.mubr.msk.bf16.mxu0 %vm1879_vm1, %v1878_v1 }
0x1358   :  { %1717 = vmatpush3.bf16.msra.mxu1 %v1999_v40  ;;  %1724 = vmatprep.mubr.msk.bf16.mxu1 %vm1879_vm1, %v1878_v1 }
0x1359   :  { %1718 = vmatprep.subr.bf16.mxu1 %v1878_v1  ;;  %1729 = vmatpush3.bf16.msra.mxu0 %v1748_v52 }
0x135a   :  { %1730 = vmatprep.subr.bf16.mxu0 %v1878_v1 }
0x135c   :  { %1719 = vmatpush3.bf16.msra.mxu1 %v2004_v42 }
0x135d   :  { %1720 = vmatprep.subr.bf16.mxu1 %v1878_v1  ;;  %1731 = vmatpush3.bf16.msra.mxu0 %v1749_v48 }
0x1360   :  { %1721 = vmatpush3.bf16.msra.mxu1 %v2017_v45 }
0x1361   :  { %1722 = vmatprep.subr.bf16.mxu1 %v1878_v1 }
0x1364   :  { %1723 = vmatpush3.bf16.msra.mxu1 %v2028_v47 }
0x1429   :  { %v1186_v59 = vpop.f32.mrb[32].mxu0 }
0x142a   :  { %v1187_v40 = vadd.f32 %v1186_v59, %v2063_v60  ;;  %v1706_v20 = vpop.f32.mrb[33].mxu0  ;;  %v1257_v61 = vpop.f32.mrb[28].mxu1 }
0x142b   :  { %v1263_v62 = vadd.f32 %v1257_v61, %v124_v58  ;;  %v1189_v63 = vpop.f32.mrb[34].mxu0  ;;  %v1714_v0 = vpop.f32.mrb[29].mxu1  ;;  %v1482_v58 = vld [vmem:[%s2333_s6] ss:$0 sm:$0xff] }
0x142c   :  { %1854 = vtanh.f32 %v1187_v40  ;;  %v1707_v42 = vpop.f32.mrb[35].mxu0  ;;  %v1260_v2 = vpop.f32.mrb[30].mxu1  ;;  %v1477_v16 = vmul.f32 -1.442695, %v1187_v40 }
0x142d   :  { %1856 = vtanh.f32 %v1263_v62  ;;  %v1715_v45 = vpop.f32.mrb[31].mxu1  ;;  %v1479_v47 = vmul.f32 -1.442695, %v1263_v62 }
0x142e   :  { %1858 = vpow2.f32 %v1477_v16 }
0x142f   :  { %1860 = vpow2.f32 %v1479_v47 }
0x1436   :  { %v1855_v4 = vpop.eup %1854 }
0x1437   :  { %v1857_v5 = vpop.eup %1856  ;;  %1201 = vrot.lane.b32.xlu1 %v1855_v4, %s1881_s4 }
0x1438   :  { %1273 = vrot.lane.b32.xlu0 %v1857_v5, %s1881_s4  ;;  %v1859_v53 = vpop.eup %1858 }
0x1439   :  { %v1861_v17 = vpop.eup %1860  ;;  %v1195_v6 = vadd.f32 1.0, %v1859_v53 }
0x143a   :  { %v1267_v7 = vadd.f32 1.0, %v1861_v17 }
0x143b   :  { %1862 = vrcp.f32 %v1195_v6 }
0x143c   :  { %1864 = vrcp.f32 %v1267_v7 }
0x1445   :  { %v1863_v3 = vpop.eup %1862 }
0x1446   :  { %v1865_v10 = vpop.eup %1864  ;;  %v1199_v13 = vmul.f32 %v1863_v3, %v2268_v37 }
0x1447   :  { %v1271_v15 = vmul.f32 %v1865_v10, %v2270_v36 }
0x14a9   :  { %v1202_v8 = vpop.permute.xlu1 %1201 }
0x14aa   :  { %v1204_v9 = vmul.f32 %v1863_v3, %v1202_v8  ;;  %v1274_v11 = vpop.permute.xlu0 %1273 }
0x14ab   :  { %v1276_v12 = vmul.f32 %v1865_v10, %v1274_v11 }
0x14ac   :  { %1206 = vrot.lane.b32.xlu1 %v1204_v9, %s1882_s15 }
0x14ad   :  { %1278 = vrot.lane.b32.xlu0 %v1276_v12, %s1882_s15 }
0x151e   :  { %v1207_v14 = vpop.permute.xlu1 %1206 }
0x151f   :  { %v1209_v18 = vadd.f32 %v1207_v14, %v1199_v13  ;;  %v1279_v19 = vpop.permute.xlu0 %1278 }
0x1520   :  { %v1281_v21 = vadd.f32 %v1279_v19, %v1271_v15 }
0x1521   :  { %1866 = vtanh.f32 %v1209_v18 }
0x1522   :  { %1868 = vtanh.f32 %v1281_v21 }
0x152b   :  { %v1867_v22 = vpop.eup %1866 }
0x152c   :  { %v1869_v51 = vpop.eup %1868  ;;  %1212 = vrot.lane.b32.xlu1 %v1867_v22, %s1881_s4 }
0x152d   :  { %1284 = vrot.lane.b32.xlu0 %v1869_v51, %s1881_s4 }
0x159e   :  { %v1213_v23 = vpop.permute.xlu1 %1212 }
0x159f   :  { %v1215_v24 = vmul.f32 %v1863_v3, %v1213_v23  ;;  %v1285_v25 = vpop.permute.xlu0 %1284 }
0x15a0   :  { %v1287_v26 = vmul.f32 %v1865_v10, %v1285_v25 }
0x15a1   :  { %1293 = vrot.lane.b32.xlu0 %v1215_v24, %s1881_s4 }
0x15a2   :  { %1289 = vrot.lane.b32.xlu1 %v1287_v26, %s1882_s15 }
0x1613   :  { %v1294_v27 = vpop.permute.xlu0 %1293 }
0x1614   :  { %v1290_v28 = vpop.permute.xlu1 %1289 }
0x1615   :  { %v1296_v29 = vsel %vm151_vm3, %v1290_v28, %v1294_v27 }
0x1616   :  { %v1297_v30 = vpack.c.bf16 %v1296_v29, %v1296_v29 }
0x1618   :  { %1725 = vmatmul.mubr.msk.bf16.vlgmr.msra.gmra.mrb[32].mxu1 %vm254_vm4, %v1297_v30 }
0x16eb   :  { %v1335_v32 = vpop.f32.mrb[32].mxu1 }
0x16ec   :  { %v1336_v31 = vadd.f32 %v1335_v32, %v2063_v60  ;;  %v1726_v33 = vpop.f32.mrb[33].mxu1 }
0x16ed   :  { %v1338_v34 = vpop.f32.mrb[34].mxu1 }
0x16ee   :  { %1870 = vtanh.f32 %v1336_v31  ;;  %v1727_v54 = vpop.f32.mrb[35].mxu1  ;;  %v1481_v37 = vmul.f32 -1.442695, %v1336_v31 }
0x16f0   :  { %1872 = vpow2.f32 %v1481_v37 }
0x16f8   :  { %v1871_v35 = vpop.eup %1870 }
0x16f9   :  { %1350 = vrot.lane.b32.xlu1 %v1871_v35, %s1881_s4 }
0x16fa   :  { %v1873_v38 = vpop.eup %1872 }
0x16fb   :  { %v1344_v36 = vadd.f32 1.0, %v1873_v38 }
0x16fd   :  { %1874 = vrcp.f32 %v1344_v36 }
0x1707   :  { %v1875_v39 = vpop.eup %1874 }
0x1708   :  { %v1348_v44 = vmul.f32 %v1875_v39, %v1209_v18 }
0x176b   :  { %v1351_v41 = vpop.permute.xlu1 %1350 }
0x176c   :  { %v1353_v43 = vmul.f32 %v1875_v39, %v1351_v41 }
0x176e   :  { %1355 = vrot.lane.b32.xlu0 %v1353_v43, %s1882_s15 }
0x17e0   :  { %v1356_v46 = vpop.permute.xlu0 %1355 }
0x17e1   :  { %v1358_v60 = vadd.f32 %v1356_v46, %v1348_v44 }
0x17e3   :  { %1876 = vtanh.f32 %v1358_v60 }
0x17ed   :  { %v1877_v49 = vpop.eup %1876 }
0x17ee   :  { %1361 = vrot.lane.b32.xlu1 %v1877_v49, %s1881_s4 }
0x1860   :  { %v1362_v50 = vpop.permute.xlu1 %1361 }
0x1861   :  { %v1364_v55 = vmul.f32 %v1875_v39, %v1362_v50 }
0x1863   :  { %v1365_v56 = vpack.c.bf16 %v1364_v55, %v1364_v55 }
0x1865   :  { %1378 = vrot.lane.b32.xlu0 %v1365_v56, %s1882_s15 }
0x18d7   :  { %v1379_v57 = vpop.permute.xlu0 %1378 }
0x18d8   :  { %1733 = vmatmul.mubr.msk.bf16.vlgmr.msra.gmra.mrb[36].mxu0 %vm151_vm3, %v1379_v57 }
0x19ab   :  { %v1429_v59 = vpop.f32.mrb[36].mxu0 }
0x19ac   :  { %v1430_v40 = vadd.f32 %v1482_v58, %v1429_v59  ;;  %v1734_v1 = vpop.f32.mrb[37].mxu0 }
0x19ad   :  { %v1432_v20 = vpop.f32.mrb[38].mxu0 }
0x19ae   :  { %1436 = vst.msk [vmem:[%s2334_s7] sm:$0xff] %vm1435_vm5, %v1430_v40  ;;  %v1735_v61 = vpop.f32.mrb[39].mxu0 }

</bundles_post_ra>
